<compile_context>
chip_gen: v6e
topology: v6e:2x2x1
jax: 0.10.0
libtpu: 0.0.40
codegen_flags: <defaults>
</compile_context>

<pallas_src>
import functools
import math

import jax
import jax.numpy as jnp
from jax.experimental import pallas as pl
from jax.experimental.pallas import tpu as pltpu


def model5_kernel(x_ref, wgru_ref, bgru_ref, wattn_ref, battn_ref,
                  w2_ref, b2_ref, out_ref, *, B, T):
    I = x_ref.shape[1]        # input size; GRU hidden == input size in model_5
    H = I
    f32 = jnp.float32

    def mm(a, b):
        return jnp.dot(a, b, preferred_element_type=f32)

    # ---- fused parameter slabs (one DMA each), sliced in-register ----
    wgru = wgru_ref[...]                                   # (2I, 3H): [W_x ; W_h]
    w_x = wgru[:I, :]                                      # (I, 3H) input->gates  [r|z|n]
    w_h = wgru[I:, :]                                      # (H, 3H) hidden->gates [r|z|n]
    bgru = bgru_ref[...]                                   # (2, 3H): [b_x ; b_h]
    b_x = bgru[0:1, :]                                     # (1, 3H)
    b_h = jnp.broadcast_to(bgru[1:2, :], (B, 3 * H))       # hoisted broadcast

    # ---- input-side GRU projection for ALL timesteps in a single matmul ----
    x2d = x_ref[...]                                       # (T*B, I), row = t*B + b
    gx_all = mm(x2d, w_x) + b_x                            # (T*B, 3H)

    # ---- GRU recurrence: one fused (B,H)x(H,3H) matmul per step ----
    h = jnp.zeros((B, H), f32)
    hs = []
    for t in range(T):
        gx = gx_all[t * B:(t + 1) * B, :]                  # (B, 3H)
        gh = mm(h, w_h) + b_h                              # (B, 3H)
        r = jax.nn.sigmoid(gx[:, :H] + gh[:, :H])
        z = jax.nn.sigmoid(gx[:, H:2 * H] + gh[:, H:2 * H])
        n = jnp.tanh(gx[:, 2 * H:] + r * gh[:, 2 * H:])    # b_hn stays inside r*()
        h = (1.0 - z) * n + z * h
        hs.append(h)
    hseq = jnp.stack(hs, axis=0)                           # (T, B, H)

    # ---- attention / MLP weight slab ----
    wattn = wattn_ref[...]                                 # (I, 2I + mlp): [wq | wv | w1]
    battn = battn_ref[...]                                 # (1, 2I + mlp): [bq | bv | b1]
    wq, wv, w1 = wattn[:, :I], wattn[:, I:2 * I], wattn[:, 2 * I:]
    bq, bv, b1 = battn[:, :I], battn[:, I:2 * I], battn[:, 2 * I:]

    # ---- attention query from temporal mean ----
    tm = jnp.sum(hseq, axis=0) * (1.0 / T)                 # (B, H)
    qtm = mm(tm, wq) + bq                                  # (B, H)

    # logits s_t = <h_t, qtm>, softmax over time, entropy normalization
    s = jnp.sum(hseq * qtm[None, :, :], axis=-1, keepdims=True)   # (T, B, 1)
    m = jnp.max(s, axis=0, keepdims=True)
    e = jnp.exp(s - m)
    att = e * pl.reciprocal(jnp.sum(e, axis=0, keepdims=True), approx=True)
    ent = -jnp.sum(att * jnp.log(att + 1e-9), axis=0, keepdims=True)  # (1, B, 1)
    att = att * pl.reciprocal(ent, approx=True)            # matches PyTorch (no clamp)

    # ---- value projection via linearity: one matmul instead of T ----
    hsum = jnp.sum(att * hseq, axis=0)                     # (B, H)
    att_sum = jnp.sum(att, axis=0)                         # (B, 1)  (not 1 after entropy norm)
    pooled = mm(hsum, wv) + att_sum * bv                   # (B, I)

    # ---- MLP head: Linear -> ReLU -> Linear -> Sigmoid ----
    h1 = jnp.maximum(mm(pooled, w1) + b1, 0.0)
    out_ref[...] = jax.nn.sigmoid(mm(h1, w2_ref[...]) + b2_ref[...])


def init_params(key, input_size, hidden_size, output_size):
    """PyTorch-style uniform(+-1/sqrt(fan_in)) init. Weights stored transposed
    to (in_features, out_features); biases as (1, out_features)."""
    I = input_size
    H = input_size  # GRU hidden == input_size in model_5

    def u(k, fan_in, shape):
        b = 1.0 / math.sqrt(fan_in)
        return jax.random.uniform(k, shape, jnp.float32, -b, b)

    ks = iter(jax.random.split(key, 24))
    p = {}
    for name in ("ir", "iz", "in"):
        p[f"w_{name}"] = u(next(ks), I, (I, H))
        p[f"b_{name}"] = u(next(ks), H, (1, H))
    for name in ("hr", "hz", "hn"):
        p[f"w_{name}"] = u(next(ks), H, (H, H))
        p[f"b_{name}"] = u(next(ks), H, (1, H))
    p["wq"] = u(next(ks), I, (I, I)); p["bq"] = u(next(ks), I, (1, I))
    p["wv"] = u(next(ks), I, (I, I)); p["bv"] = u(next(ks), I, (1, I))
    p["w1"] = u(next(ks), I, (I, hidden_size))
    p["b1"] = u(next(ks), I, (1, hidden_size))
    p["w2"] = u(next(ks), hidden_size, (hidden_size, output_size))
    p["b2"] = u(next(ks), hidden_size, (1, output_size))
    return p


def fuse_params(p):
    """Concatenate the 20 small parameters into 6 DMA slabs."""
    w_gru = jnp.concatenate(
        [jnp.concatenate([p["w_ir"], p["w_iz"], p["w_in"]], axis=1),
         jnp.concatenate([p["w_hr"], p["w_hz"], p["w_hn"]], axis=1)], axis=0)  # (2I, 3H)
    b_gru = jnp.concatenate(
        [jnp.concatenate([p["b_ir"], p["b_iz"], p["b_in"]], axis=1),
         jnp.concatenate([p["b_hr"], p["b_hz"], p["b_hn"]], axis=1)], axis=0)  # (2, 3H)
    w_attn = jnp.concatenate([p["wq"], p["wv"], p["w1"]], axis=1)              # (I, 2I+mlp)
    b_attn = jnp.concatenate([p["bq"], p["bv"], p["b1"]], axis=1)              # (1, 2I+mlp)
    return w_gru, b_gru, w_attn, b_attn, p["w2"], p["b2"]


def model5_forward(x, p):
    B, T, I = x.shape
    # Row order t*B + b so the per-step gate slab is a contiguous row block.
    x2d = jnp.transpose(x, (1, 0, 2)).reshape(T * B, I)
    w_gru, b_gru, w_attn, b_attn, w2, b2 = fuse_params(p)

    kernel = functools.partial(model5_kernel, B=B, T=T)
    vmem = pl.BlockSpec(memory_space=pltpu.MemorySpace.VMEM)
    out_shape = jax.ShapeDtypeStruct((B, w2.shape[1]), jnp.float32)
    return pl.pallas_call(
        kernel,
        out_shape=out_shape,
        in_specs=[vmem] * 7,
        out_specs=vmem,
    )(x2d, w_gru, b_gru, w_attn, b_attn, w2, b2)


if __name__ == "__main__":
    batch, seq_len = 2, 8
    input_size, hidden_size, output_size = 32, 32, 1

    key = jax.random.PRNGKey(0)
    kx, kp = jax.random.split(key)
    x = jax.random.normal(kx, (batch, seq_len, input_size), jnp.float32)
    params = init_params(kp, input_size, hidden_size, output_size)

    out = jax.jit(model5_forward)(x, params)
    out = jax.block_until_ready(out)

    assert out.shape == (batch, output_size)
    assert bool(jnp.all(jnp.isfinite(out)))
    assert bool(jnp.all((out >= 0.0) & (out <= 1.0)))  # sigmoid range
    print("KERNEL_OK")
</pallas_src>

<mosaic_0001>
module attributes {stable_mosaic.version = 11 : i64} {
  func.func @model5_kernel(%arg0: memref<16x32xf32, #tpu.memory_space<vmem>>, %arg1: memref<64x96xf32, #tpu.memory_space<vmem>>, %arg2: memref<2x96xf32, #tpu.memory_space<vmem>>, %arg3: memref<32x96xf32, #tpu.memory_space<vmem>>, %arg4: memref<1x96xf32, #tpu.memory_space<vmem>>, %arg5: memref<32x1xf32, #tpu.memory_space<vmem>>, %arg6: memref<1x1xf32, #tpu.memory_space<vmem>>, %arg7: memref<2x1xf32, #tpu.memory_space<vmem>>) attributes {dimension_semantics = [], scalar_prefetch = 0 : i64, scratch_operands = 0 : i64, tpu.core_type = #tpu.core_type<tc>} {
    %c0 = arith.constant 0 : index
    %c0_0 = arith.constant 0 : index
    %0 = vector.load %arg1[%c0, %c0_0] : memref<64x96xf32, #tpu.memory_space<vmem>>, vector<64x96xf32>
    %1 = vector.extract_strided_slice %0 {offsets = [0, 0], sizes = [32, 96], strides = [1, 1]} : vector<64x96xf32> to vector<32x96xf32>
    %2 = vector.extract_strided_slice %0 {offsets = [32, 0], sizes = [32, 96], strides = [1, 1]} : vector<64x96xf32> to vector<32x96xf32>
    %c0_1 = arith.constant 0 : index
    %c0_2 = arith.constant 0 : index
    %3 = vector.load %arg2[%c0_1, %c0_2] : memref<2x96xf32, #tpu.memory_space<vmem>>, vector<2x96xf32>
    %4 = vector.extract_strided_slice %3 {offsets = [0, 0], sizes = [1, 96], strides = [1, 1]} : vector<2x96xf32> to vector<1x96xf32>
    %5 = vector.extract_strided_slice %3 {offsets = [1, 0], sizes = [1, 96], strides = [1, 1]} : vector<2x96xf32> to vector<1x96xf32>
    %6 = vector.shape_cast %5 : vector<1x96xf32> to vector<1x96xf32>
    %7 = vector.broadcast %6 : vector<1x96xf32> to vector<2x96xf32>
    %c0_3 = arith.constant 0 : index
    %c0_4 = arith.constant 0 : index
    %8 = vector.load %arg0[%c0_3, %c0_4] : memref<16x32xf32, #tpu.memory_space<vmem>>, vector<16x32xf32>
    %cst = arith.constant dense<0.000000e+00> : vector<16x96xf32>
    %9 = tpu.matmul %8, %1, %cst {dimension_numbers = #tpu.dot_dimension_numbers<[1], [0], [0], [1], [0, 0, 1, 1], [], []>} : vector<16x32xf32>, vector<32x96xf32>, vector<16x96xf32> -> vector<16x96xf32>
    %10 = vector.broadcast %4 : vector<1x96xf32> to vector<16x96xf32>
    %11 = arith.addf %9, %10 : vector<16x96xf32>
    %cst_5 = arith.constant 0.000000e+00 : f32
    %12 = vector.broadcast %cst_5 : f32 to vector<2x32xf32>
    %13 = vector.extract_strided_slice %11 {offsets = [0, 0], sizes = [2, 96], strides = [1, 1]} : vector<16x96xf32> to vector<2x96xf32>
    %cst_6 = arith.constant dense<0.000000e+00> : vector<2x96xf32>
    %14 = tpu.matmul %12, %2, %cst_6 {dimension_numbers = #tpu.dot_dimension_numbers<[1], [0], [0], [1], [0, 0, 1, 1], [], []>} : vector<2x32xf32>, vector<32x96xf32>, vector<2x96xf32> -> vector<2x96xf32>
    %15 = arith.addf %14, %7 : vector<2x96xf32>
    %16 = vector.extract_strided_slice %13 {offsets = [0, 0], sizes = [2, 32], strides = [1, 1]} : vector<2x96xf32> to vector<2x32xf32>
    %17 = vector.extract_strided_slice %15 {offsets = [0, 0], sizes = [2, 32], strides = [1, 1]} : vector<2x96xf32> to vector<2x32xf32>
    %18 = arith.addf %16, %17 : vector<2x32xf32>
    %19 = arith.negf %18 : vector<2x32xf32>
    %20 = math.exp %19 : vector<2x32xf32>
    %cst_7 = arith.constant 1.000000e+00 : f32
    %21 = vector.broadcast %cst_7 : f32 to vector<2x32xf32>
    %22 = arith.addf %21, %20 : vector<2x32xf32>
    %23 = arith.divf %21, %22 : vector<2x32xf32>
    %24 = vector.extract_strided_slice %13 {offsets = [0, 32], sizes = [2, 32], strides = [1, 1]} : vector<2x96xf32> to vector<2x32xf32>
    %25 = vector.extract_strided_slice %15 {offsets = [0, 32], sizes = [2, 32], strides = [1, 1]} : vector<2x96xf32> to vector<2x32xf32>
    %26 = arith.addf %24, %25 : vector<2x32xf32>
    %27 = arith.negf %26 : vector<2x32xf32>
    %28 = math.exp %27 : vector<2x32xf32>
    %cst_8 = arith.constant 1.000000e+00 : f32
    %29 = vector.broadcast %cst_8 : f32 to vector<2x32xf32>
    %30 = arith.addf %29, %28 : vector<2x32xf32>
    %31 = arith.divf %29, %30 : vector<2x32xf32>
    %32 = vector.extract_strided_slice %13 {offsets = [0, 64], sizes = [2, 32], strides = [1, 1]} : vector<2x96xf32> to vector<2x32xf32>
    %33 = vector.extract_strided_slice %15 {offsets = [0, 64], sizes = [2, 32], strides = [1, 1]} : vector<2x96xf32> to vector<2x32xf32>
    %34 = arith.mulf %23, %33 : vector<2x32xf32>
    %35 = arith.addf %32, %34 : vector<2x32xf32>
    %36 = math.tanh %35 : vector<2x32xf32>
    %cst_9 = arith.constant 1.000000e+00 : f32
    %37 = vector.broadcast %cst_9 : f32 to vector<2x32xf32>
    %38 = arith.subf %37, %31 : vector<2x32xf32>
    %39 = arith.mulf %38, %36 : vector<2x32xf32>
    %40 = arith.mulf %31, %12 : vector<2x32xf32>
    %41 = arith.addf %39, %40 : vector<2x32xf32>
    %42 = vector.extract_strided_slice %11 {offsets = [2, 0], sizes = [2, 96], strides = [1, 1]} : vector<16x96xf32> to vector<2x96xf32>
    %cst_10 = arith.constant dense<0.000000e+00> : vector<2x96xf32>
    %43 = tpu.matmul %41, %2, %cst_10 {dimension_numbers = #tpu.dot_dimension_numbers<[1], [0], [0], [1], [0, 0, 1, 1], [], []>} : vector<2x32xf32>, vector<32x96xf32>, vector<2x96xf32> -> vector<2x96xf32>
    %44 = arith.addf %43, %7 : vector<2x96xf32>
    %45 = vector.extract_strided_slice %42 {offsets = [0, 0], sizes = [2, 32], strides = [1, 1]} : vector<2x96xf32> to vector<2x32xf32>
    %46 = vector.extract_strided_slice %44 {offsets = [0, 0], sizes = [2, 32], strides = [1, 1]} : vector<2x96xf32> to vector<2x32xf32>
    %47 = arith.addf %45, %46 : vector<2x32xf32>
    %48 = arith.negf %47 : vector<2x32xf32>
    %49 = math.exp %48 : vector<2x32xf32>
    %cst_11 = arith.constant 1.000000e+00 : f32
    %50 = vector.broadcast %cst_11 : f32 to vector<2x32xf32>
    %51 = arith.addf %50, %49 : vector<2x32xf32>
    %52 = arith.divf %50, %51 : vector<2x32xf32>
    %53 = vector.extract_strided_slice %42 {offsets = [0, 32], sizes = [2, 32], strides = [1, 1]} : vector<2x96xf32> to vector<2x32xf32>
    %54 = vector.extract_strided_slice %44 {offsets = [0, 32], sizes = [2, 32], strides = [1, 1]} : vector<2x96xf32> to vector<2x32xf32>
    %55 = arith.addf %53, %54 : vector<2x32xf32>
    %56 = arith.negf %55 : vector<2x32xf32>
    %57 = math.exp %56 : vector<2x32xf32>
    %cst_12 = arith.constant 1.000000e+00 : f32
    %58 = vector.broadcast %cst_12 : f32 to vector<2x32xf32>
    %59 = arith.addf %58, %57 : vector<2x32xf32>
    %60 = arith.divf %58, %59 : vector<2x32xf32>
    %61 = vector.extract_strided_slice %42 {offsets = [0, 64], sizes = [2, 32], strides = [1, 1]} : vector<2x96xf32> to vector<2x32xf32>
    %62 = vector.extract_strided_slice %44 {offsets = [0, 64], sizes = [2, 32], strides = [1, 1]} : vector<2x96xf32> to vector<2x32xf32>
    %63 = arith.mulf %52, %62 : vector<2x32xf32>
    %64 = arith.addf %61, %63 : vector<2x32xf32>
    %65 = math.tanh %64 : vector<2x32xf32>
    %cst_13 = arith.constant 1.000000e+00 : f32
    %66 = vector.broadcast %cst_13 : f32 to vector<2x32xf32>
    %67 = arith.subf %66, %60 : vector<2x32xf32>
    %68 = arith.mulf %67, %65 : vector<2x32xf32>
    %69 = arith.mulf %60, %41 : vector<2x32xf32>
    %70 = arith.addf %68, %69 : vector<2x32xf32>
    %71 = vector.extract_strided_slice %11 {offsets = [4, 0], sizes = [2, 96], strides = [1, 1]} : vector<16x96xf32> to vector<2x96xf32>
    %cst_14 = arith.constant dense<0.000000e+00> : vector<2x96xf32>
    %72 = tpu.matmul %70, %2, %cst_14 {dimension_numbers = #tpu.dot_dimension_numbers<[1], [0], [0], [1], [0, 0, 1, 1], [], []>} : vector<2x32xf32>, vector<32x96xf32>, vector<2x96xf32> -> vector<2x96xf32>
    %73 = arith.addf %72, %7 : vector<2x96xf32>
    %74 = vector.extract_strided_slice %71 {offsets = [0, 0], sizes = [2, 32], strides = [1, 1]} : vector<2x96xf32> to vector<2x32xf32>
    %75 = vector.extract_strided_slice %73 {offsets = [0, 0], sizes = [2, 32], strides = [1, 1]} : vector<2x96xf32> to vector<2x32xf32>
    %76 = arith.addf %74, %75 : vector<2x32xf32>
    %77 = arith.negf %76 : vector<2x32xf32>
    %78 = math.exp %77 : vector<2x32xf32>
    %cst_15 = arith.constant 1.000000e+00 : f32
    %79 = vector.broadcast %cst_15 : f32 to vector<2x32xf32>
    %80 = arith.addf %79, %78 : vector<2x32xf32>
    %81 = arith.divf %79, %80 : vector<2x32xf32>
    %82 = vector.extract_strided_slice %71 {offsets = [0, 32], sizes = [2, 32], strides = [1, 1]} : vector<2x96xf32> to vector<2x32xf32>
    %83 = vector.extract_strided_slice %73 {offsets = [0, 32], sizes = [2, 32], strides = [1, 1]} : vector<2x96xf32> to vector<2x32xf32>
    %84 = arith.addf %82, %83 : vector<2x32xf32>
    %85 = arith.negf %84 : vector<2x32xf32>
    %86 = math.exp %85 : vector<2x32xf32>
    %cst_16 = arith.constant 1.000000e+00 : f32
    %87 = vector.broadcast %cst_16 : f32 to vector<2x32xf32>
    %88 = arith.addf %87, %86 : vector<2x32xf32>
    %89 = arith.divf %87, %88 : vector<2x32xf32>
    %90 = vector.extract_strided_slice %71 {offsets = [0, 64], sizes = [2, 32], strides = [1, 1]} : vector<2x96xf32> to vector<2x32xf32>
    %91 = vector.extract_strided_slice %73 {offsets = [0, 64], sizes = [2, 32], strides = [1, 1]} : vector<2x96xf32> to vector<2x32xf32>
    %92 = arith.mulf %81, %91 : vector<2x32xf32>
    %93 = arith.addf %90, %92 : vector<2x32xf32>
    %94 = math.tanh %93 : vector<2x32xf32>
    %cst_17 = arith.constant 1.000000e+00 : f32
    %95 = vector.broadcast %cst_17 : f32 to vector<2x32xf32>
    %96 = arith.subf %95, %89 : vector<2x32xf32>
    %97 = arith.mulf %96, %94 : vector<2x32xf32>
    %98 = arith.mulf %89, %70 : vector<2x32xf32>
    %99 = arith.addf %97, %98 : vector<2x32xf32>
    %100 = vector.extract_strided_slice %11 {offsets = [6, 0], sizes = [2, 96], strides = [1, 1]} : vector<16x96xf32> to vector<2x96xf32>
    %cst_18 = arith.constant dense<0.000000e+00> : vector<2x96xf32>
    %101 = tpu.matmul %99, %2, %cst_18 {dimension_numbers = #tpu.dot_dimension_numbers<[1], [0], [0], [1], [0, 0, 1, 1], [], []>} : vector<2x32xf32>, vector<32x96xf32>, vector<2x96xf32> -> vector<2x96xf32>
    %102 = arith.addf %101, %7 : vector<2x96xf32>
    %103 = vector.extract_strided_slice %100 {offsets = [0, 0], sizes = [2, 32], strides = [1, 1]} : vector<2x96xf32> to vector<2x32xf32>
    %104 = vector.extract_strided_slice %102 {offsets = [0, 0], sizes = [2, 32], strides = [1, 1]} : vector<2x96xf32> to vector<2x32xf32>
    %105 = arith.addf %103, %104 : vector<2x32xf32>
    %106 = arith.negf %105 : vector<2x32xf32>
    %107 = math.exp %106 : vector<2x32xf32>
    %cst_19 = arith.constant 1.000000e+00 : f32
    %108 = vector.broadcast %cst_19 : f32 to vector<2x32xf32>
    %109 = arith.addf %108, %107 : vector<2x32xf32>
    %110 = arith.divf %108, %109 : vector<2x32xf32>
    %111 = vector.extract_strided_slice %100 {offsets = [0, 32], sizes = [2, 32], strides = [1, 1]} : vector<2x96xf32> to vector<2x32xf32>
    %112 = vector.extract_strided_slice %102 {offsets = [0, 32], sizes = [2, 32], strides = [1, 1]} : vector<2x96xf32> to vector<2x32xf32>
    %113 = arith.addf %111, %112 : vector<2x32xf32>
    %114 = arith.negf %113 : vector<2x32xf32>
    %115 = math.exp %114 : vector<2x32xf32>
    %cst_20 = arith.constant 1.000000e+00 : f32
    %116 = vector.broadcast %cst_20 : f32 to vector<2x32xf32>
    %117 = arith.addf %116, %115 : vector<2x32xf32>
    %118 = arith.divf %116, %117 : vector<2x32xf32>
    %119 = vector.extract_strided_slice %100 {offsets = [0, 64], sizes = [2, 32], strides = [1, 1]} : vector<2x96xf32> to vector<2x32xf32>
    %120 = vector.extract_strided_slice %102 {offsets = [0, 64], sizes = [2, 32], strides = [1, 1]} : vector<2x96xf32> to vector<2x32xf32>
    %121 = arith.mulf %110, %120 : vector<2x32xf32>
    %122 = arith.addf %119, %121 : vector<2x32xf32>
    %123 = math.tanh %122 : vector<2x32xf32>
    %cst_21 = arith.constant 1.000000e+00 : f32
    %124 = vector.broadcast %cst_21 : f32 to vector<2x32xf32>
    %125 = arith.subf %124, %118 : vector<2x32xf32>
    %126 = arith.mulf %125, %123 : vector<2x32xf32>
    %127 = arith.mulf %118, %99 : vector<2x32xf32>
    %128 = arith.addf %126, %127 : vector<2x32xf32>
    %129 = vector.extract_strided_slice %11 {offsets = [8, 0], sizes = [2, 96], strides = [1, 1]} : vector<16x96xf32> to vector<2x96xf32>
    %cst_22 = arith.constant dense<0.000000e+00> : vector<2x96xf32>
    %130 = tpu.matmul %128, %2, %cst_22 {dimension_numbers = #tpu.dot_dimension_numbers<[1], [0], [0], [1], [0, 0, 1, 1], [], []>} : vector<2x32xf32>, vector<32x96xf32>, vector<2x96xf32> -> vector<2x96xf32>
    %131 = arith.addf %130, %7 : vector<2x96xf32>
    %132 = vector.extract_strided_slice %129 {offsets = [0, 0], sizes = [2, 32], strides = [1, 1]} : vector<2x96xf32> to vector<2x32xf32>
    %133 = vector.extract_strided_slice %131 {offsets = [0, 0], sizes = [2, 32], strides = [1, 1]} : vector<2x96xf32> to vector<2x32xf32>
    %134 = arith.addf %132, %133 : vector<2x32xf32>
    %135 = arith.negf %134 : vector<2x32xf32>
    %136 = math.exp %135 : vector<2x32xf32>
    %cst_23 = arith.constant 1.000000e+00 : f32
    %137 = vector.broadcast %cst_23 : f32 to vector<2x32xf32>
    %138 = arith.addf %137, %136 : vector<2x32xf32>
    %139 = arith.divf %137, %138 : vector<2x32xf32>
    %140 = vector.extract_strided_slice %129 {offsets = [0, 32], sizes = [2, 32], strides = [1, 1]} : vector<2x96xf32> to vector<2x32xf32>
    %141 = vector.extract_strided_slice %131 {offsets = [0, 32], sizes = [2, 32], strides = [1, 1]} : vector<2x96xf32> to vector<2x32xf32>
    %142 = arith.addf %140, %141 : vector<2x32xf32>
    %143 = arith.negf %142 : vector<2x32xf32>
    %144 = math.exp %143 : vector<2x32xf32>
    %cst_24 = arith.constant 1.000000e+00 : f32
    %145 = vector.broadcast %cst_24 : f32 to vector<2x32xf32>
    %146 = arith.addf %145, %144 : vector<2x32xf32>
    %147 = arith.divf %145, %146 : vector<2x32xf32>
    %148 = vector.extract_strided_slice %129 {offsets = [0, 64], sizes = [2, 32], strides = [1, 1]} : vector<2x96xf32> to vector<2x32xf32>
    %149 = vector.extract_strided_slice %131 {offsets = [0, 64], sizes = [2, 32], strides = [1, 1]} : vector<2x96xf32> to vector<2x32xf32>
    %150 = arith.mulf %139, %149 : vector<2x32xf32>
    %151 = arith.addf %148, %150 : vector<2x32xf32>
    %152 = math.tanh %151 : vector<2x32xf32>
    %cst_25 = arith.constant 1.000000e+00 : f32
    %153 = vector.broadcast %cst_25 : f32 to vector<2x32xf32>
    %154 = arith.subf %153, %147 : vector<2x32xf32>
    %155 = arith.mulf %154, %152 : vector<2x32xf32>
    %156 = arith.mulf %147, %128 : vector<2x32xf32>
    %157 = arith.addf %155, %156 : vector<2x32xf32>
    %158 = vector.extract_strided_slice %11 {offsets = [10, 0], sizes = [2, 96], strides = [1, 1]} : vector<16x96xf32> to vector<2x96xf32>
    %cst_26 = arith.constant dense<0.000000e+00> : vector<2x96xf32>
    %159 = tpu.matmul %157, %2, %cst_26 {dimension_numbers = #tpu.dot_dimension_numbers<[1], [0], [0], [1], [0, 0, 1, 1], [], []>} : vector<2x32xf32>, vector<32x96xf32>, vector<2x96xf32> -> vector<2x96xf32>
    %160 = arith.addf %159, %7 : vector<2x96xf32>
    %161 = vector.extract_strided_slice %158 {offsets = [0, 0], sizes = [2, 32], strides = [1, 1]} : vector<2x96xf32> to vector<2x32xf32>
    %162 = vector.extract_strided_slice %160 {offsets = [0, 0], sizes = [2, 32], strides = [1, 1]} : vector<2x96xf32> to vector<2x32xf32>
    %163 = arith.addf %161, %162 : vector<2x32xf32>
    %164 = arith.negf %163 : vector<2x32xf32>
    %165 = math.exp %164 : vector<2x32xf32>
    %cst_27 = arith.constant 1.000000e+00 : f32
    %166 = vector.broadcast %cst_27 : f32 to vector<2x32xf32>
    %167 = arith.addf %166, %165 : vector<2x32xf32>
    %168 = arith.divf %166, %167 : vector<2x32xf32>
    %169 = vector.extract_strided_slice %158 {offsets = [0, 32], sizes = [2, 32], strides = [1, 1]} : vector<2x96xf32> to vector<2x32xf32>
    %170 = vector.extract_strided_slice %160 {offsets = [0, 32], sizes = [2, 32], strides = [1, 1]} : vector<2x96xf32> to vector<2x32xf32>
    %171 = arith.addf %169, %170 : vector<2x32xf32>
    %172 = arith.negf %171 : vector<2x32xf32>
    %173 = math.exp %172 : vector<2x32xf32>
    %cst_28 = arith.constant 1.000000e+00 : f32
    %174 = vector.broadcast %cst_28 : f32 to vector<2x32xf32>
    %175 = arith.addf %174, %173 : vector<2x32xf32>
    %176 = arith.divf %174, %175 : vector<2x32xf32>
    %177 = vector.extract_strided_slice %158 {offsets = [0, 64], sizes = [2, 32], strides = [1, 1]} : vector<2x96xf32> to vector<2x32xf32>
    %178 = vector.extract_strided_slice %160 {offsets = [0, 64], sizes = [2, 32], strides = [1, 1]} : vector<2x96xf32> to vector<2x32xf32>
    %179 = arith.mulf %168, %178 : vector<2x32xf32>
    %180 = arith.addf %177, %179 : vector<2x32xf32>
    %181 = math.tanh %180 : vector<2x32xf32>
    %cst_29 = arith.constant 1.000000e+00 : f32
    %182 = vector.broadcast %cst_29 : f32 to vector<2x32xf32>
    %183 = arith.subf %182, %176 : vector<2x32xf32>
    %184 = arith.mulf %183, %181 : vector<2x32xf32>
    %185 = arith.mulf %176, %157 : vector<2x32xf32>
    %186 = arith.addf %184, %185 : vector<2x32xf32>
    %187 = vector.extract_strided_slice %11 {offsets = [12, 0], sizes = [2, 96], strides = [1, 1]} : vector<16x96xf32> to vector<2x96xf32>
    %cst_30 = arith.constant dense<0.000000e+00> : vector<2x96xf32>
    %188 = tpu.matmul %186, %2, %cst_30 {dimension_numbers = #tpu.dot_dimension_numbers<[1], [0], [0], [1], [0, 0, 1, 1], [], []>} : vector<2x32xf32>, vector<32x96xf32>, vector<2x96xf32> -> vector<2x96xf32>
    %189 = arith.addf %188, %7 : vector<2x96xf32>
    %190 = vector.extract_strided_slice %187 {offsets = [0, 0], sizes = [2, 32], strides = [1, 1]} : vector<2x96xf32> to vector<2x32xf32>
    %191 = vector.extract_strided_slice %189 {offsets = [0, 0], sizes = [2, 32], strides = [1, 1]} : vector<2x96xf32> to vector<2x32xf32>
    %192 = arith.addf %190, %191 : vector<2x32xf32>
    %193 = arith.negf %192 : vector<2x32xf32>
    %194 = math.exp %193 : vector<2x32xf32>
    %cst_31 = arith.constant 1.000000e+00 : f32
    %195 = vector.broadcast %cst_31 : f32 to vector<2x32xf32>
    %196 = arith.addf %195, %194 : vector<2x32xf32>
    %197 = arith.divf %195, %196 : vector<2x32xf32>
    %198 = vector.extract_strided_slice %187 {offsets = [0, 32], sizes = [2, 32], strides = [1, 1]} : vector<2x96xf32> to vector<2x32xf32>
    %199 = vector.extract_strided_slice %189 {offsets = [0, 32], sizes = [2, 32], strides = [1, 1]} : vector<2x96xf32> to vector<2x32xf32>
    %200 = arith.addf %198, %199 : vector<2x32xf32>
    %201 = arith.negf %200 : vector<2x32xf32>
    %202 = math.exp %201 : vector<2x32xf32>
    %cst_32 = arith.constant 1.000000e+00 : f32
    %203 = vector.broadcast %cst_32 : f32 to vector<2x32xf32>
    %204 = arith.addf %203, %202 : vector<2x32xf32>
    %205 = arith.divf %203, %204 : vector<2x32xf32>
    %206 = vector.extract_strided_slice %187 {offsets = [0, 64], sizes = [2, 32], strides = [1, 1]} : vector<2x96xf32> to vector<2x32xf32>
    %207 = vector.extract_strided_slice %189 {offsets = [0, 64], sizes = [2, 32], strides = [1, 1]} : vector<2x96xf32> to vector<2x32xf32>
    %208 = arith.mulf %197, %207 : vector<2x32xf32>
    %209 = arith.addf %206, %208 : vector<2x32xf32>
    %210 = math.tanh %209 : vector<2x32xf32>
    %cst_33 = arith.constant 1.000000e+00 : f32
    %211 = vector.broadcast %cst_33 : f32 to vector<2x32xf32>
    %212 = arith.subf %211, %205 : vector<2x32xf32>
    %213 = arith.mulf %212, %210 : vector<2x32xf32>
    %214 = arith.mulf %205, %186 : vector<2x32xf32>
    %215 = arith.addf %213, %214 : vector<2x32xf32>
    %216 = vector.extract_strided_slice %11 {offsets = [14, 0], sizes = [2, 96], strides = [1, 1]} : vector<16x96xf32> to vector<2x96xf32>
    %cst_34 = arith.constant dense<0.000000e+00> : vector<2x96xf32>
    %217 = tpu.matmul %215, %2, %cst_34 {dimension_numbers = #tpu.dot_dimension_numbers<[1], [0], [0], [1], [0, 0, 1, 1], [], []>} : vector<2x32xf32>, vector<32x96xf32>, vector<2x96xf32> -> vector<2x96xf32>
    %218 = arith.addf %217, %7 : vector<2x96xf32>
    %219 = vector.extract_strided_slice %216 {offsets = [0, 0], sizes = [2, 32], strides = [1, 1]} : vector<2x96xf32> to vector<2x32xf32>
    %220 = vector.extract_strided_slice %218 {offsets = [0, 0], sizes = [2, 32], strides = [1, 1]} : vector<2x96xf32> to vector<2x32xf32>
    %221 = arith.addf %219, %220 : vector<2x32xf32>
    %222 = arith.negf %221 : vector<2x32xf32>
    %223 = math.exp %222 : vector<2x32xf32>
    %cst_35 = arith.constant 1.000000e+00 : f32
    %224 = vector.broadcast %cst_35 : f32 to vector<2x32xf32>
    %225 = arith.addf %224, %223 : vector<2x32xf32>
    %226 = arith.divf %224, %225 : vector<2x32xf32>
    %227 = vector.extract_strided_slice %216 {offsets = [0, 32], sizes = [2, 32], strides = [1, 1]} : vector<2x96xf32> to vector<2x32xf32>
    %228 = vector.extract_strided_slice %218 {offsets = [0, 32], sizes = [2, 32], strides = [1, 1]} : vector<2x96xf32> to vector<2x32xf32>
    %229 = arith.addf %227, %228 : vector<2x32xf32>
    %230 = arith.negf %229 : vector<2x32xf32>
    %231 = math.exp %230 : vector<2x32xf32>
    %cst_36 = arith.constant 1.000000e+00 : f32
    %232 = vector.broadcast %cst_36 : f32 to vector<2x32xf32>
    %233 = arith.addf %232, %231 : vector<2x32xf32>
    %234 = arith.divf %232, %233 : vector<2x32xf32>
    %235 = vector.extract_strided_slice %216 {offsets = [0, 64], sizes = [2, 32], strides = [1, 1]} : vector<2x96xf32> to vector<2x32xf32>
    %236 = vector.extract_strided_slice %218 {offsets = [0, 64], sizes = [2, 32], strides = [1, 1]} : vector<2x96xf32> to vector<2x32xf32>
    %237 = arith.mulf %226, %236 : vector<2x32xf32>
    %238 = arith.addf %235, %237 : vector<2x32xf32>
    %239 = math.tanh %238 : vector<2x32xf32>
    %cst_37 = arith.constant 1.000000e+00 : f32
    %240 = vector.broadcast %cst_37 : f32 to vector<2x32xf32>
    %241 = arith.subf %240, %234 : vector<2x32xf32>
    %242 = arith.mulf %241, %239 : vector<2x32xf32>
    %243 = arith.mulf %234, %215 : vector<2x32xf32>
    %244 = arith.addf %242, %243 : vector<2x32xf32>
    %245 = vector.shape_cast %41 : vector<2x32xf32> to vector<1x2x32xf32>
    %246 = vector.shape_cast %70 : vector<2x32xf32> to vector<1x2x32xf32>
    %247 = vector.shape_cast %99 : vector<2x32xf32> to vector<1x2x32xf32>
    %248 = vector.shape_cast %128 : vector<2x32xf32> to vector<1x2x32xf32>
    %249 = vector.shape_cast %157 : vector<2x32xf32> to vector<1x2x32xf32>
    %250 = vector.shape_cast %186 : vector<2x32xf32> to vector<1x2x32xf32>
    %251 = vector.shape_cast %215 : vector<2x32xf32> to vector<1x2x32xf32>
    %252 = vector.shape_cast %244 : vector<2x32xf32> to vector<1x2x32xf32>
    %253 = tpu.concatenate %245, %246, %247, %248, %249, %250, %251, %252 in 0 : vector<1x2x32xf32>, vector<1x2x32xf32>, vector<1x2x32xf32>, vector<1x2x32xf32>, vector<1x2x32xf32>, vector<1x2x32xf32>, vector<1x2x32xf32>, vector<1x2x32xf32> -> vector<8x2x32xf32>
    %c0_38 = arith.constant 0 : index
    %c0_39 = arith.constant 0 : index
    %254 = vector.load %arg3[%c0_38, %c0_39] : memref<32x96xf32, #tpu.memory_space<vmem>>, vector<32x96xf32>
    %c0_40 = arith.constant 0 : index
    %c0_41 = arith.constant 0 : index
    %255 = vector.load %arg4[%c0_40, %c0_41] : memref<1x96xf32, #tpu.memory_space<vmem>>, vector<1x96xf32>
    %256 = vector.extract_strided_slice %254 {offsets = [0, 0], sizes = [32, 32], strides = [1, 1]} : vector<32x96xf32> to vector<32x32xf32>
    %257 = vector.extract_strided_slice %254 {offsets = [0, 32], sizes = [32, 32], strides = [1, 1]} : vector<32x96xf32> to vector<32x32xf32>
    %258 = vector.extract_strided_slice %254 {offsets = [0, 64], sizes = [32, 32], strides = [1, 1]} : vector<32x96xf32> to vector<32x32xf32>
    %259 = vector.extract_strided_slice %255 {offsets = [0, 0], sizes = [1, 32], strides = [1, 1]} : vector<1x96xf32> to vector<1x32xf32>
    %260 = vector.extract_strided_slice %255 {offsets = [0, 32], sizes = [1, 32], strides = [1, 1]} : vector<1x96xf32> to vector<1x32xf32>
    %261 = vector.extract_strided_slice %255 {offsets = [0, 64], sizes = [1, 32], strides = [1, 1]} : vector<1x96xf32> to vector<1x32xf32>
    %cst_42 = arith.constant dense<0.000000e+00> : vector<2x32xf32>
    %262 = vector.multi_reduction <add>, %253, %cst_42 [0] : vector<8x2x32xf32> to vector<2x32xf32>
    %cst_43 = arith.constant 1.250000e-01 : f32
    %263 = vector.broadcast %cst_43 : f32 to vector<2x32xf32>
    %264 = arith.mulf %262, %263 : vector<2x32xf32>
    %cst_44 = arith.constant dense<0.000000e+00> : vector<2x32xf32>
    %265 = tpu.matmul %264, %256, %cst_44 {dimension_numbers = #tpu.dot_dimension_numbers<[1], [0], [0], [1], [0, 0, 1, 1], [], []>} : vector<2x32xf32>, vector<32x32xf32>, vector<2x32xf32> -> vector<2x32xf32>
    %266 = vector.broadcast %259 : vector<1x32xf32> to vector<2x32xf32>
    %267 = arith.addf %265, %266 : vector<2x32xf32>
    %268 = vector.shape_cast %267 : vector<2x32xf32> to vector<1x2x32xf32>
    %269 = vector.broadcast %268 : vector<1x2x32xf32> to vector<8x2x32xf32>
    %270 = arith.mulf %253, %269 : vector<8x2x32xf32>
    %cst_45 = arith.constant dense<0.000000e+00> : vector<8x2xf32>
    %271 = vector.multi_reduction <add>, %270, %cst_45 [2] : vector<8x2x32xf32> to vector<8x2xf32>
    %272 = vector.shape_cast %271 : vector<8x2xf32> to vector<8x2x1xf32>
    %cst_46 = arith.constant dense<0xFF800000> : vector<2x1xf32>
    %273 = vector.multi_reduction <maximumf>, %272, %cst_46 [0] : vector<8x2x1xf32> to vector<2x1xf32>
    %274 = vector.shape_cast %273 : vector<2x1xf32> to vector<1x2x1xf32>
    %275 = vector.broadcast %274 : vector<1x2x1xf32> to vector<8x2x1xf32>
    %276 = arith.subf %272, %275 : vector<8x2x1xf32>
    %277 = math.exp %276 : vector<8x2x1xf32>
    %cst_47 = arith.constant dense<0.000000e+00> : vector<2x1xf32>
    %278 = vector.multi_reduction <add>, %277, %cst_47 [0] : vector<8x2x1xf32> to vector<2x1xf32>
    %279 = vector.shape_cast %278 : vector<2x1xf32> to vector<1x2x1xf32>
    %280 = tpu.reciprocal %279 {approx = true} : vector<1x2x1xf32> -> vector<1x2x1xf32>
    %281 = vector.broadcast %280 : vector<1x2x1xf32> to vector<8x2x1xf32>
    %282 = arith.mulf %277, %281 : vector<8x2x1xf32>
    %cst_48 = arith.constant 9.99999971E-10 : f32
    %283 = vector.broadcast %cst_48 : f32 to vector<8x2x1xf32>
    %284 = arith.addf %282, %283 : vector<8x2x1xf32>
    %285 = math.log %284 : vector<8x2x1xf32>
    %286 = arith.mulf %282, %285 : vector<8x2x1xf32>
    %cst_49 = arith.constant dense<0.000000e+00> : vector<2x1xf32>
    %287 = vector.multi_reduction <add>, %286, %cst_49 [0] : vector<8x2x1xf32> to vector<2x1xf32>
    %288 = vector.shape_cast %287 : vector<2x1xf32> to vector<1x2x1xf32>
    %cst_50 = arith.constant 0.000000e+00 : f32
    %289 = vector.broadcast %cst_50 : f32 to vector<1x2x1xf32>
    %290 = arith.subf %289, %288 : vector<1x2x1xf32>
    %291 = tpu.reciprocal %290 {approx = true} : vector<1x2x1xf32> -> vector<1x2x1xf32>
    %292 = vector.broadcast %291 : vector<1x2x1xf32> to vector<8x2x1xf32>
    %293 = arith.mulf %282, %292 : vector<8x2x1xf32>
    %294 = vector.broadcast %293 : vector<8x2x1xf32> to vector<8x2x32xf32>
    %295 = arith.mulf %294, %253 : vector<8x2x32xf32>
    %cst_51 = arith.constant dense<0.000000e+00> : vector<2x32xf32>
    %296 = vector.multi_reduction <add>, %295, %cst_51 [0] : vector<8x2x32xf32> to vector<2x32xf32>
    %cst_52 = arith.constant dense<0.000000e+00> : vector<2x1xf32>
    %297 = vector.multi_reduction <add>, %293, %cst_52 [0] : vector<8x2x1xf32> to vector<2x1xf32>
    %cst_53 = arith.constant dense<0.000000e+00> : vector<2x32xf32>
    %298 = tpu.matmul %296, %257, %cst_53 {dimension_numbers = #tpu.dot_dimension_numbers<[1], [0], [0], [1], [0, 0, 1, 1], [], []>} : vector<2x32xf32>, vector<32x32xf32>, vector<2x32xf32> -> vector<2x32xf32>
    %299 = vector.broadcast %297 : vector<2x1xf32> to vector<2x32xf32>
    %300 = vector.broadcast %260 : vector<1x32xf32> to vector<2x32xf32>
    %301 = arith.mulf %299, %300 : vector<2x32xf32>
    %302 = arith.addf %298, %301 : vector<2x32xf32>
    %cst_54 = arith.constant dense<0.000000e+00> : vector<2x32xf32>
    %303 = tpu.matmul %302, %258, %cst_54 {dimension_numbers = #tpu.dot_dimension_numbers<[1], [0], [0], [1], [0, 0, 1, 1], [], []>} : vector<2x32xf32>, vector<32x32xf32>, vector<2x32xf32> -> vector<2x32xf32>
    %304 = vector.broadcast %261 : vector<1x32xf32> to vector<2x32xf32>
    %305 = arith.addf %303, %304 : vector<2x32xf32>
    %cst_55 = arith.constant 0.000000e+00 : f32
    %306 = vector.broadcast %cst_55 : f32 to vector<2x32xf32>
    %307 = arith.maximumf %305, %306 : vector<2x32xf32>
    %c0_56 = arith.constant 0 : index
    %c0_57 = arith.constant 0 : index
    %308 = vector.load %arg5[%c0_56, %c0_57] : memref<32x1xf32, #tpu.memory_space<vmem>>, vector<32x1xf32>
    %cst_58 = arith.constant dense<0.000000e+00> : vector<2x1xf32>
    %309 = tpu.matmul %307, %308, %cst_58 {dimension_numbers = #tpu.dot_dimension_numbers<[1], [0], [0], [1], [0, 0, 1, 1], [], []>} : vector<2x32xf32>, vector<32x1xf32>, vector<2x1xf32> -> vector<2x1xf32>
    %c0_59 = arith.constant 0 : index
    %c0_60 = arith.constant 0 : index
    %310 = vector.load %arg6[%c0_59, %c0_60] : memref<1x1xf32, #tpu.memory_space<vmem>>, vector<1x1xf32>
    %311 = vector.broadcast %310 : vector<1x1xf32> to vector<2x1xf32>
    %312 = arith.addf %309, %311 : vector<2x1xf32>
    %313 = arith.negf %312 : vector<2x1xf32>
    %314 = math.exp %313 : vector<2x1xf32>
    %cst_61 = arith.constant 1.000000e+00 : f32
    %315 = vector.broadcast %cst_61 : f32 to vector<2x1xf32>
    %316 = arith.addf %315, %314 : vector<2x1xf32>
    %317 = arith.divf %315, %316 : vector<2x1xf32>
    %c0_62 = arith.constant 0 : index
    %c0_63 = arith.constant 0 : index
    %318 = vector.load %arg7[%c0_62, %c0_63] : memref<2x1xf32, #tpu.memory_space<vmem>>, vector<2x1xf32>
    tpu.vector_store %arg7[%c0_62, %c0_63], %317 {strides = array<i32>} : memref<2x1xf32, #tpu.memory_space<vmem>>, vector<2x1xf32>,
    return
  }
}

</mosaic_0001>

<bundles_post_ra>
// kernel: model5_forward.1
= control target key start
LH: loop header
LB: loop body
LE: loop exit
PB: predicated region body
PF: predicated region fallthrough
CT: control target
= control target key end

     0   :  { %v1910_v0 = vmov 0.0   ;;  %vm1911_vm0 = vmmov 0   ;;  %vm47_vm1 = vcmask 261120   ;;  %v37_v11 = vlaneseq  ;;  %s1912_s21 = smov 64   ;;  %s1914_s8 = smov 32   ;;  %s2399_s1 = inlined_call_operand.vmem [shape: f32[64,96], index: 1, kind: input, shape index: {}]   ;;  %s2400_s0 = inlined_call_operand.vmem [shape: f32[16,32], index: 0, kind: input, shape index: {}]   ;;  %s2401_s2 = inlined_call_operand.vmem [shape: f32[2,96], index: 2, kind: input, shape index: {}]   ;;  %s2402_s3 = inlined_call_operand.vmem [shape: f32[32,96], index: 3, kind: input, shape index: {}]   ;;  %s2403_s4 = inlined_call_operand.vmem [shape: f32[1,96], index: 4, kind: input, shape index: {}]   ;;  %s2404_s5 = inlined_call_operand.vmem [shape: f32[32,1], index: 5, kind: input, shape index: {}]   ;;  %s2405_s6 = inlined_call_operand.<no memory space> [shape: f32[1,1], index: 6, kind: input, shape index: {}]   ;;  %s2406_s7 = inlined_call_operand.vmem [shape: f32[2,1], index: 7, kind: output, shape index: {}]  }
   0x1   :  { %1685 = vmatprep.subr.mxu1 %v1910_v0  ;;  %v31_v1 = vld [vmem:[%s2399_s1 + $0x18] sm:$0xff]  ;;  %v30_v3 = vld [vmem:[%s2399_s1 + $0x10] sm:$0xff]  ;;  %1693 = vmatprep.mubr.msk.f32.mxu1 %vm1911_vm0, %v1910_v0  ;;  %v29_v5 = vld [vmem:[%s2399_s1 + $0x8] sm:$0xff]  ;;  %vm977_vm2 = vcmask 517376   ;;  %vm1119_vm3 = vcmask 254976   ;;  %vm1144_vm4 = vcmask 1041408  }
   0x2   :  { %v1962_v2 = vld [vmem:[%s2399_s1 + $0x38] sm:$0xff]  ;;  %1674 = vmatprep.subr.mxu0 %v31_v1  ;;  %v1973_v4 = vld [vmem:[%s2399_s1 + $0x30] sm:$0xff]  ;;  %v1982_v6 = vld [vmem:[%s2399_s1 + $0x28] sm:$0xff]  ;;  %v38_v12 = vshrl.u32 %v37_v11, 7  ;;  %vm1578_vm5 = vcmask 1024  }
   0x3   :  { %1686 = vmatpush3.msra.mxu1 %v1962_v2  ;;  %1675 = vmatpush3.msra.mxu0 %v31_v1  ;;  %v28_v7 = vld [vmem:[%s2399_s1] sm:$0xff]  ;;  %v42_v10 = vld [vmem:[%s2400_s0 + $0x8] sm:$0xff] }
   0x4   :  { %1687 = vmatprep.subr.mxu1 %v1910_v0  ;;  %1676 = vmatprep.subr.mxu0 %v30_v3  ;;  %v1992_v8 = vld [vmem:[%s2399_s1 + $0x20] sm:$0xff]  ;;  %v39_v13 = vsub.s32 1, %v38_v12  ;;  %v45_v15 = vsub.s32 0, %v38_v12 }
   0x5   :  { %1688 = vmatpush3.msra.mxu1 %v1973_v4  ;;  %1677 = vmatpush3.msra.mxu0 %v30_v3  ;;  %v41_v9 = vld [vmem:[%s2400_s0] sm:$0xff] }
   0x6   :  { %1689 = vmatprep.subr.mxu1 %v1910_v0  ;;  %1678 = vmatprep.subr.mxu0 %v29_v5  ;;  %v36_v14 = vld [vmem:[%s2401_s2] sm:$0x3]  ;;  %s1913_s2 = smov 96  }
   0x7   :  { %1690 = vmatpush3.msra.mxu1 %v1982_v6  ;;  %1679 = vmatpush3.msra.mxu0 %v29_v5  ;;  %v2031_v16 = vrot.slane %v36_v14, %v39_v13  ;;  %v46_v17 = vrot.slane %v36_v14, %v45_v15 }
   0x8   :  { %1691 = vmatprep.subr.mxu1 %v1910_v0  ;;  %1680 = vmatprep.subr.mxu0 %v28_v7 }
   0x9   :  { %1692 = vmatpush3.msra.mxu1 %v1992_v8  ;;  %1681 = vmatpush3.msra.mxu0 %v28_v7 }
   0xa   :  { %1682 = vmatprep.mubr.msk.f32.mxu0 %vm47_vm1, %v41_v9  ;;  %1694 = vmatmul.mubr.f32.vlgmr.msra.gmra.mxu1 %v1910_v0 }
   0xb   :  { %1683 = vmatmul.mubr.msk.f32.vlgmr.msra.gmra.mxu0 %vm47_vm1, %v42_v10  ;;  %1696 = vmatprep.subr.mxu0 %v1910_v0 }
   0xc   :  { %1704 = vmatprep.mubr.msk.f32.mxu0 %vm1911_vm0, %v1910_v0  ;;  %1697 = vmatpush3.msra.mxu0 %v1962_v2 }
   0xd   :  { %1707 = vmatprep.subr.mxu1 %v1910_v0  ;;  %1698 = vmatprep.subr.mxu0 %v1910_v0 }
   0xe   :  { %1708 = vmatpush3.msra.mxu1 %v1962_v2  ;;  %1699 = vmatpush3.msra.mxu0 %v1973_v4 }
   0xf   :  { %1709 = vmatprep.subr.mxu1 %v1910_v0  ;;  %1700 = vmatprep.subr.mxu0 %v1910_v0 }
  0x10   :  { %1710 = vmatpush3.msra.mxu1 %v1973_v4  ;;  %1701 = vmatpush3.msra.mxu0 %v1982_v6 }
  0x11   :  { %1711 = vmatprep.subr.mxu1 %v1910_v0  ;;  %1702 = vmatprep.subr.mxu0 %v1910_v0 }
  0x12   :  { %1712 = vmatpush3.msra.mxu1 %v1982_v6  ;;  %1703 = vmatpush3.msra.mxu0 %v1992_v8 }
  0x13   :  { %1713 = vmatprep.subr.mxu1 %v1910_v0  ;;  %1715 = vmatprep.mubr.msk.f32.mxu1 %vm1911_vm0, %v1910_v0 }
  0x14   :  { %1714 = vmatpush3.msra.mxu1 %v1992_v8  ;;  %1718 = vmatprep.subr.mxu0 %v1910_v0 }
  0x15   :  { %1729 = vmatprep.subr.mxu1 %v1910_v0 }
  0xca   :  { %v198_v18 = vpop.f32.mrf.mxu1 }
  0xcb   :  { %v1684_v19 = vpop.f32.mrf.mxu0  ;;  %v199_v20 = vadd.f32 %v198_v18, %v2031_v16 }
  0xcc   :  { %v2034_v21 = vadd.f32 %v1684_v19, %v46_v17  ;;  %v1695_v22 = vpop.f32.mrf.mxu1 }
  0xcd   :  { %210 = vrot.lane.b32.xlu0 %v199_v20, %s1912_s21  ;;  %v120_v23 = vpop.f32.mrf.mxu0 }
  0xce   :  { %v2037_v24 = vadd.f32 %v120_v23, %v46_v17 }
  0xd0   :  { %v202_v25 = vadd.f32 %v199_v20, %v2037_v24 }
  0xd2   :  { %v1586_v26 = vmul.f32 -1.442695, %v202_v25 }
  0xd4   :  { %1822 = vpow2.f32 %v1586_v26 }
  0xe1   :  { %v1823_v27 = vpop.eup %1822 }
  0xe2   :  { %v206_v28 = vadd.f32 1.0, %v1823_v27 }
  0xe4   :  { %1824 = vrcp.f32 %v206_v28 }
  0xf1   :  { %v1825_v29 = vpop.eup %1824 }
  0xf2   :  { %v220_v35 = vsub.f32 1.0, %v1825_v29  ;;  %v226_v37 = vmul.f32 0.0, %v1825_v29 }
 0x13f   :  { %v211_v30 = vpop.permute.xlu0 %210 }
 0x140   :  { %v213_v31 = vmul.f32 %v1825_v29, %v211_v30 }
 0x142   :  { %215 = vrot.lane.b32.xlu0 %v213_v31, %s1912_s21 }
 0x1b4   :  { %v216_v32 = vpop.permute.xlu0 %215 }
 0x1b5   :  { %v218_v33 = vadd.f32 %v216_v32, %v2037_v24 }
 0x1b7   :  { %1826 = vtanh.f32 %v218_v33 }
 0x1c4   :  { %v1827_v34 = vpop.eup %1826 }
 0x1c5   :  { %222 = vrot.lane.b32.xlu1 %v1827_v34, %s1913_s2 }
 0x237   :  { %v223_v36 = vpop.permute.xlu1 %222 }
 0x238   :  { %v225_v38 = vmul.f32 %v223_v36, %v220_v35 }
 0x23a   :  { %v2043_v39 = vadd.f32 %v226_v37, %v225_v38 }
 0x23c   :  { %229 = vrot.lane.b32.xlu1 %v2043_v39, %s1913_s2  ;;  %v329_v56 = vrot.slane %v2043_v39, 6 }
 0x2ae   :  { %v230_v40 = vpop.permute.xlu1 %229 }
 0x2af   :  { %1705 = vmatmul.mubr.msk.f32.vlgmr.msra.gmra.mxu0 %vm47_vm1, %v230_v40 }
 0x2b0   :  { %1719 = vmatpush3.msra.mxu0 %v1962_v2  ;;  %1726 = vmatprep.mubr.msk.f32.mxu0 %vm1911_vm0, %v1910_v0 }
 0x2b1   :  { %1720 = vmatprep.subr.mxu0 %v1910_v0 }
 0x2b2   :  { %1721 = vmatpush3.msra.mxu0 %v1973_v4 }
 0x2b3   :  { %1722 = vmatprep.subr.mxu0 %v1910_v0 }
 0x2b4   :  { %1723 = vmatpush3.msra.mxu0 %v1982_v6 }
 0x2b5   :  { %1724 = vmatprep.subr.mxu0 %v1910_v0 }
 0x2b6   :  { %1725 = vmatpush3.msra.mxu0 %v1992_v8 }
 0x2b7   :  { %1740 = vmatprep.subr.mxu0 %v1910_v0 }
 0x36f   :  { %v299_v41 = vpop.f32.mrf.mxu0 }
 0x370   :  { %v300_v42 = vadd.f32 %v299_v41, %v2031_v16 }
 0x371   :  { %v1706_v43 = vpop.f32.mrf.mxu0 }
 0x372   :  { %v304_v44 = vrot.slane %v300_v42, 6 }
 0x374   :  { %313 = vrot.lane.b32.xlu0 %v304_v44, %s1912_s21  ;;  %v306_v45 = vadd.f32 %v304_v44, %v2037_v24 }
 0x376   :  { %v1588_v46 = vmul.f32 -1.442695, %v306_v45 }
 0x378   :  { %1828 = vpow2.f32 %v1588_v46 }
 0x385   :  { %v1829_v47 = vpop.eup %1828 }
 0x386   :  { %v310_v48 = vadd.f32 1.0, %v1829_v47 }
 0x388   :  { %1830 = vrcp.f32 %v310_v48 }
 0x395   :  { %v1831_v49 = vpop.eup %1830 }
 0x396   :  { %v323_v55 = vsub.f32 1.0, %v1831_v49  ;;  %v331_v59 = vmul.f32 %v1831_v49, %v329_v56 }
 0x3e6   :  { %v314_v50 = vpop.permute.xlu0 %313 }
 0x3e7   :  { %v316_v51 = vmul.f32 %v1831_v49, %v314_v50 }
 0x3e9   :  { %318 = vrot.lane.b32.xlu1 %v316_v51, %s1912_s21 }
 0x45b   :  { %v319_v52 = vpop.permute.xlu1 %318 }
 0x45c   :  { %v321_v53 = vadd.f32 %v319_v52, %v2037_v24 }
 0x45e   :  { %1832 = vtanh.f32 %v321_v53 }
 0x46b   :  { %v1833_v54 = vpop.eup %1832 }
 0x46c   :  { %325 = vrot.lane.b32.xlu0 %v1833_v54, %s1913_s2 }
 0x4de   :  { %v326_v57 = vpop.permute.xlu0 %325 }
 0x4df   :  { %v328_v58 = vmul.f32 %v326_v57, %v323_v55 }
 0x4e1   :  { %v332_v60 = vadd.f32 %v331_v59, %v328_v58 }
 0x4e3   :  { %v2065_v61 = vrot.slane %v332_v60, 2  ;;  %v435_v19 = vrot.slane %v332_v60, 6 }
 0x4e5   :  { %335 = vrot.lane.b32.xlu1 %v2065_v61, %s1913_s2 }
 0x557   :  { %v336_v62 = vpop.permute.xlu1 %335 }
 0x558   :  { %1716 = vmatmul.mubr.msk.f32.vlgmr.msra.gmra.mxu1 %vm47_vm1, %v336_v62 }
 0x559   :  { %1730 = vmatpush3.msra.mxu1 %v1962_v2  ;;  %1737 = vmatprep.mubr.msk.f32.mxu1 %vm1911_vm0, %v1910_v0 }
 0x55a   :  { %1731 = vmatprep.subr.mxu1 %v1910_v0 }
 0x55b   :  { %1732 = vmatpush3.msra.mxu1 %v1973_v4 }
 0x55c   :  { %1733 = vmatprep.subr.mxu1 %v1910_v0 }
 0x55d   :  { %1734 = vmatpush3.msra.mxu1 %v1982_v6 }
 0x55e   :  { %1735 = vmatprep.subr.mxu1 %v1910_v0 }
 0x55f   :  { %1736 = vmatpush3.msra.mxu1 %v1992_v8 }
 0x560   :  { %1751 = vmatprep.subr.mxu1 %v1910_v0 }
 0x618   :  { %v405_v63 = vpop.f32.mrf.mxu1 }
 0x619   :  { %v406_v1 = vadd.f32 %v405_v63, %v2031_v16 }
 0x61a   :  { %v1717_v3 = vpop.f32.mrf.mxu1 }
 0x61b   :  { %v410_v5 = vrot.slane %v406_v1, 4 }
 0x61d   :  { %419 = vrot.lane.b32.xlu0 %v410_v5, %s1912_s21  ;;  %v412_v7 = vadd.f32 %v410_v5, %v2037_v24 }
 0x61f   :  { %v1590_v9 = vmul.f32 -1.442695, %v412_v7 }
 0x621   :  { %1834 = vpow2.f32 %v1590_v9 }
 0x62e   :  { %v1835_v10 = vpop.eup %1834 }
 0x62f   :  { %v416_v11 = vadd.f32 1.0, %v1835_v10 }
 0x631   :  { %1836 = vrcp.f32 %v416_v11 }
 0x63e   :  { %v1837_v12 = vpop.eup %1836 }
 0x63f   :  { %v429_v20 = vsub.f32 1.0, %v1837_v12  ;;  %v437_v23 = vmul.f32 %v1837_v12, %v435_v19 }
 0x68f   :  { %v420_v13 = vpop.permute.xlu0 %419 }
 0x690   :  { %v422_v14 = vmul.f32 %v1837_v12, %v420_v13 }
 0x692   :  { %424 = vrot.lane.b32.xlu1 %v422_v14, %s1912_s21 }
 0x704   :  { %v425_v15 = vpop.permute.xlu1 %424 }
 0x705   :  { %v427_v17 = vadd.f32 %v425_v15, %v2037_v24 }
 0x707   :  { %1838 = vtanh.f32 %v427_v17 }
 0x714   :  { %v1839_v18 = vpop.eup %1838 }
 0x715   :  { %431 = vrot.lane.b32.xlu0 %v1839_v18, %s1913_s2 }
 0x787   :  { %v432_v22 = vpop.permute.xlu0 %431 }
 0x788   :  { %v434_v25 = vmul.f32 %v432_v22, %v429_v20 }
 0x78a   :  { %v438_v26 = vadd.f32 %v437_v23, %v434_v25 }
 0x78c   :  { %v2086_v27 = vrot.slane %v438_v26, 4  ;;  %v541_v44 = vrot.slane %v438_v26, 6 }
 0x78e   :  { %441 = vrot.lane.b32.xlu1 %v2086_v27, %s1913_s2 }
 0x800   :  { %v442_v28 = vpop.permute.xlu1 %441 }
 0x801   :  { %1727 = vmatmul.mubr.msk.f32.vlgmr.msra.gmra.mxu0 %vm47_vm1, %v442_v28 }
 0x802   :  { %1741 = vmatpush3.msra.mxu0 %v1962_v2  ;;  %1748 = vmatprep.mubr.msk.f32.mxu0 %vm1911_vm0, %v1910_v0 }
 0x803   :  { %1742 = vmatprep.subr.mxu0 %v1910_v0 }
 0x804   :  { %1743 = vmatpush3.msra.mxu0 %v1973_v4 }
 0x805   :  { %1744 = vmatprep.subr.mxu0 %v1910_v0 }
 0x806   :  { %1745 = vmatpush3.msra.mxu0 %v1982_v6 }
 0x807   :  { %1746 = vmatprep.subr.mxu0 %v1910_v0 }
 0x808   :  { %1747 = vmatpush3.msra.mxu0 %v1992_v8 }
 0x809   :  { %1762 = vmatprep.subr.mxu0 %v1910_v0 }
 0x8c1   :  { %v511_v29 = vpop.f32.mrf.mxu0 }
 0x8c2   :  { %v512_v30 = vadd.f32 %v511_v29, %v2031_v16 }
 0x8c3   :  { %v1728_v31 = vpop.f32.mrf.mxu0 }
 0x8c4   :  { %v516_v32 = vrot.slane %v512_v30, 2 }
 0x8c6   :  { %525 = vrot.lane.b32.xlu0 %v516_v32, %s1912_s21  ;;  %v518_v33 = vadd.f32 %v516_v32, %v2037_v24 }
 0x8c8   :  { %v1592_v34 = vmul.f32 -1.442695, %v518_v33 }
 0x8ca   :  { %1840 = vpow2.f32 %v1592_v34 }
 0x8d7   :  { %v1841_v35 = vpop.eup %1840 }
 0x8d8   :  { %v522_v36 = vadd.f32 1.0, %v1841_v35 }
 0x8da   :  { %1842 = vrcp.f32 %v522_v36 }
 0x8e7   :  { %v1843_v37 = vpop.eup %1842 }
 0x8e8   :  { %v535_v45 = vsub.f32 1.0, %v1843_v37  ;;  %v543_v47 = vmul.f32 %v1843_v37, %v541_v44 }
 0x938   :  { %v526_v38 = vpop.permute.xlu0 %525 }
 0x939   :  { %v528_v40 = vmul.f32 %v1843_v37, %v526_v38 }
 0x93b   :  { %530 = vrot.lane.b32.xlu1 %v528_v40, %s1912_s21 }
 0x9ad   :  { %v531_v41 = vpop.permute.xlu1 %530 }
 0x9ae   :  { %v533_v42 = vadd.f32 %v531_v41, %v2037_v24 }
 0x9b0   :  { %1844 = vtanh.f32 %v533_v42 }
 0x9bd   :  { %v1845_v43 = vpop.eup %1844 }
 0x9be   :  { %537 = vrot.lane.b32.xlu0 %v1845_v43, %s1913_s2 }
 0xa30   :  { %v538_v46 = vpop.permute.xlu0 %537 }
 0xa31   :  { %v540_v48 = vmul.f32 %v538_v46, %v535_v45 }
 0xa33   :  { %v544_v49 = vadd.f32 %v543_v47, %v540_v48 }
 0xa35   :  { %v2107_v50 = vrot.slane %v544_v49, 6 }
 0xa37   :  { %547 = vrot.lane.b32.xlu1 %v2107_v50, %s1913_s2 }
 0xaa9   :  { %v548_v51 = vpop.permute.xlu1 %547 }
 0xaaa   :  { %1738 = vmatmul.mubr.msk.f32.vlgmr.msra.gmra.mxu1 %vm47_vm1, %v548_v51 }
 0xaab   :  { %1752 = vmatpush3.msra.mxu1 %v1962_v2  ;;  %1759 = vmatprep.mubr.msk.f32.mxu1 %vm1911_vm0, %v1910_v0 }
 0xaac   :  { %1753 = vmatprep.subr.mxu1 %v1910_v0 }
 0xaad   :  { %1754 = vmatpush3.msra.mxu1 %v1973_v4 }
 0xaae   :  { %1755 = vmatprep.subr.mxu1 %v1910_v0 }
 0xaaf   :  { %1756 = vmatpush3.msra.mxu1 %v1982_v6 }
 0xab0   :  { %1757 = vmatprep.subr.mxu1 %v1910_v0 }
 0xab1   :  { %1758 = vmatpush3.msra.mxu1 %v1992_v8 }
 0xab2   :  { %1773 = vmatprep.subr.mxu1 %v1910_v0 }
 0xb6a   :  { %v617_v24 = vpop.f32.mrf.mxu1 }
 0xb6b   :  { %v618_v52 = vadd.f32 %v617_v24, %v2031_v16 }
 0xb6c   :  { %v1739_v53 = vpop.f32.mrf.mxu1 }
 0xb6d   :  { %629 = vrot.lane.b32.xlu0 %v618_v52, %s1912_s21  ;;  %v621_v54 = vadd.f32 %v618_v52, %v2034_v21 }
 0xb6f   :  { %v1594_v55 = vmul.f32 -1.442695, %v621_v54 }
 0xb71   :  { %1846 = vpow2.f32 %v1594_v55 }
 0xb7e   :  { %v1847_v56 = vpop.eup %1846 }
 0xb7f   :  { %v625_v57 = vadd.f32 1.0, %v1847_v56 }
 0xb81   :  { %1848 = vrcp.f32 %v625_v57 }
 0xb8e   :  { %v1849_v58 = vpop.eup %1848 }
 0xb8f   :  { %v639_v3 = vsub.f32 1.0, %v1849_v58  ;;  %v646_v7 = vmul.f32 %v1849_v58, %v2107_v50 }
 0xbdf   :  { %v630_v59 = vpop.permute.xlu0 %629 }
 0xbe0   :  { %v632_v60 = vmul.f32 %v1849_v58, %v630_v59 }
 0xbe2   :  { %634 = vrot.lane.b32.xlu1 %v632_v60, %s1912_s21 }
 0xc54   :  { %v635_v62 = vpop.permute.xlu1 %634 }
 0xc55   :  { %v637_v63 = vadd.f32 %v635_v62, %v2034_v21 }
 0xc57   :  { %1850 = vtanh.f32 %v637_v63 }
 0xc64   :  { %v1851_v1 = vpop.eup %1850 }
 0xc65   :  { %641 = vrot.lane.b32.xlu0 %v1851_v1, %s1913_s2 }
 0xcd7   :  { %v642_v5 = vpop.permute.xlu0 %641 }
 0xcd8   :  { %v644_v9 = vmul.f32 %v642_v5, %v639_v3 }
 0xcda   :  { %v2129_v10 = vadd.f32 %v646_v7, %v644_v9 }
 0xcdc   :  { %649 = vrot.lane.b32.xlu1 %v2129_v10, %s1913_s2  ;;  %v749_v26 = vrot.slane %v2129_v10, 6 }
 0xd4e   :  { %v650_v11 = vpop.permute.xlu1 %649 }
 0xd4f   :  { %1749 = vmatmul.mubr.msk.f32.vlgmr.msra.gmra.mxu0 %vm47_vm1, %v650_v11 }
 0xd50   :  { %1763 = vmatpush3.msra.mxu0 %v1962_v2  ;;  %1770 = vmatprep.mubr.msk.f32.mxu0 %vm1911_vm0, %v1910_v0 }
 0xd51   :  { %1764 = vmatprep.subr.mxu0 %v1910_v0 }
 0xd52   :  { %1765 = vmatpush3.msra.mxu0 %v1973_v4 }
 0xd53   :  { %1766 = vmatprep.subr.mxu0 %v1910_v0 }
 0xd54   :  { %1767 = vmatpush3.msra.mxu0 %v1982_v6 }
 0xd55   :  { %1768 = vmatprep.subr.mxu0 %v1910_v0 }
 0xd56   :  { %1769 = vmatpush3.msra.mxu0 %v1992_v8 }
 0xd57   :  { %1784 = vmatprep.subr.mxu0 %v1910_v0 }
 0xe0f   :  { %v719_v12 = vpop.f32.mrf.mxu0 }
 0xe10   :  { %v720_v2 = vadd.f32 %v719_v12, %v2031_v16 }
 0xe11   :  { %v1750_v13 = vpop.f32.mrf.mxu0 }
 0xe12   :  { %v724_v14 = vrot.slane %v720_v2, 6  ;;  %v2179_v2 = vld [vmem:[%s2402_s3 + $0x18] sm:$0xff]  ;;  %v2184_v13 = vld [vmem:[%s2402_s3 + $0x10] sm:$0xff] }
 0xe14   :  { %733 = vrot.lane.b32.xlu0 %v724_v14, %s1912_s21  ;;  %v726_v15 = vadd.f32 %v724_v14, %v2034_v21  ;;  %v2199_v14 = vld [vmem:[%s2402_s3] sm:$0xff] }
 0xe16   :  { %v1596_v4 = vmul.f32 -1.442695, %v726_v15  ;;  %v979_v15 = vsel %vm977_vm2, %v2065_v61, 0.0 }
 0xe18   :  { %1852 = vpow2.f32 %v1596_v4  ;;  %v978_v4 = vsel %vm977_vm2, %v2043_v39, 0.0 }
 0xe25   :  { %v1853_v17 = vpop.eup %1852 }
 0xe26   :  { %v730_v18 = vadd.f32 1.0, %v1853_v17  ;;  %v981_v17 = vsel %vm977_vm2, %v2086_v27, 0.0 }
 0xe28   :  { %1854 = vrcp.f32 %v730_v18  ;;  %v980_v18 = vadd.f32 %v979_v15, %v978_v4 }
 0xe35   :  { %v1855_v6 = vpop.eup %1854 }
 0xe36   :  { %v743_v25 = vsub.f32 1.0, %v1855_v6  ;;  %v751_v30 = vmul.f32 %v1855_v6, %v749_v26 }
 0xe86   :  { %v734_v19 = vpop.permute.xlu0 %733 }
 0xe87   :  { %v736_v20 = vmul.f32 %v1855_v6, %v734_v19  ;;  %v983_v6 = vsel %vm977_vm2, %v2107_v50, 0.0  ;;  %v982_v19 = vadd.f32 %v981_v17, %v980_v18 }
 0xe89   :  { %738 = vrot.lane.b32.xlu1 %v736_v20, %s1912_s21 }
 0xefb   :  { %v739_v8 = vpop.permute.xlu1 %738 }
 0xefc   :  { %v741_v22 = vadd.f32 %v739_v8, %v2034_v21 }
 0xefe   :  { %1856 = vtanh.f32 %v741_v22  ;;  %v985_v22 = vsel %vm977_vm2, %v2129_v10, 0.0 }
 0xf0b   :  { %v1857_v23 = vpop.eup %1856 }
 0xf0c   :  { %745 = vrot.lane.b32.xlu0 %v1857_v23, %s1913_s2 }
 0xf7e   :  { %v746_v28 = vpop.permute.xlu0 %745 }
 0xf7f   :  { %v748_v29 = vmul.f32 %v746_v28, %v743_v25  ;;  %v984_v25 = vadd.f32 %v983_v6, %v982_v19 }
 0xf81   :  { %v752_v31 = vadd.f32 %v751_v30, %v748_v29  ;;  %v986_v30 = vadd.f32 %v985_v22, %v984_v25 }
 0xf83   :  { %v2151_v32 = vrot.slane %v752_v31, 2  ;;  %v855_v49 = vrot.slane %v752_v31, 6 }
 0xf85   :  { %755 = vrot.lane.b32.xlu1 %v2151_v32, %s1913_s2  ;;  %v987_v29 = vsel %vm977_vm2, %v2151_v32, 0.0 }
 0xff7   :  { %v756_v33 = vpop.permute.xlu1 %755 }
 0xff8   :  { %1760 = vmatmul.mubr.msk.f32.vlgmr.msra.gmra.mxu1 %vm47_vm1, %v756_v33 }
 0xff9   :  { %1781 = vmatprep.mubr.msk.f32.mxu1 %vm1911_vm0, %v1910_v0  ;;  %1774 = vmatpush3.msra.mxu1 %v2179_v2 }
 0xffa   :  { %1775 = vmatprep.subr.mxu1 %v1910_v0 }
 0xffb   :  { %1776 = vmatpush3.msra.mxu1 %v2184_v13 }
 0xffc   :  { %1777 = vmatprep.subr.mxu1 %v1910_v0 }
0x10b8   :  { %v825_v34 = vpop.f32.mrf.mxu1 }
0x10b9   :  { %v826_v35 = vadd.f32 %v825_v34, %v2031_v16  ;;  %v988_v34 = vadd.f32 %v987_v29, %v986_v30 }
0x10ba   :  { %v1761_v36 = vpop.f32.mrf.mxu1 }
0x10bb   :  { %v830_v37 = vrot.slane %v826_v35, 4 }
0x10bd   :  { %839 = vrot.lane.b32.xlu0 %v830_v37, %s1912_s21  ;;  %v832_v38 = vadd.f32 %v830_v37, %v2034_v21 }
0x10bf   :  { %v1598_v40 = vmul.f32 -1.442695, %v832_v38 }
0x10c1   :  { %1858 = vpow2.f32 %v1598_v40 }
0x10ce   :  { %v1859_v41 = vpop.eup %1858 }
0x10cf   :  { %v836_v42 = vadd.f32 1.0, %v1859_v41 }
0x10d1   :  { %1860 = vrcp.f32 %v836_v42  ;;  %v2230_v42 = vld [vmem:[%s2403_s4] ss:$0 sm:$0xff] }
0x10de   :  { %v1861_v43 = vpop.eup %1860 }
0x10df   :  { %v849_v51 = vsub.f32 1.0, %v1861_v43  ;;  %v857_v52 = vmul.f32 %v1861_v43, %v855_v49 }
0x112f   :  { %v840_v44 = vpop.permute.xlu0 %839 }
0x1130   :  { %v842_v45 = vmul.f32 %v1861_v43, %v840_v44 }
0x1132   :  { %844 = vrot.lane.b32.xlu1 %v842_v45, %s1912_s21 }
0x11a4   :  { %v845_v46 = vpop.permute.xlu1 %844 }
0x11a5   :  { %v847_v47 = vadd.f32 %v845_v46, %v2034_v21 }
0x11a7   :  { %1862 = vtanh.f32 %v847_v47 }
0x11b4   :  { %v1863_v48 = vpop.eup %1862 }
0x11b5   :  { %851 = vrot.lane.b32.xlu0 %v1863_v48, %s1913_s2 }
0x1227   :  { %v852_v24 = vpop.permute.xlu0 %851 }
0x1228   :  { %v854_v53 = vmul.f32 %v852_v24, %v849_v51 }
0x122a   :  { %v858_v54 = vadd.f32 %v857_v52, %v854_v53 }
0x122c   :  { %v2164_v55 = vrot.slane %v858_v54, 4  ;;  %v961_v20 = vrot.slane %v858_v54, 6 }
0x122e   :  { %861 = vrot.lane.b32.xlu1 %v2164_v55, %s1913_s2  ;;  %v989_v33 = vsel %vm977_vm2, %v2164_v55, 0.0 }
0x122f   :  { %v990_v36 = vadd.f32 %v989_v33, %v988_v34 }
0x12a0   :  { %v862_v56 = vpop.permute.xlu1 %861 }
0x12a1   :  { %1771 = vmatmul.mubr.msk.f32.vlgmr.msra.gmra.mxu0 %vm47_vm1, %v862_v56 }
0x12a2   :  { %1792 = vmatprep.mubr.msk.f32.mxu0 %vm1911_vm0, %v1910_v0 }
0x1361   :  { %v931_v57 = vpop.f32.mrf.mxu0 }
0x1362   :  { %v932_v58 = vadd.f32 %v931_v57, %v2031_v16 }
0x1363   :  { %v1772_v59 = vpop.f32.mrf.mxu0 }
0x1364   :  { %v936_v60 = vrot.slane %v932_v58, 2 }
0x1366   :  { %945 = vrot.lane.b32.xlu0 %v936_v60, %s1912_s21  ;;  %v938_v62 = vadd.f32 %v936_v60, %v2034_v21 }
0x1368   :  { %v1600_v63 = vmul.f32 -1.442695, %v938_v62 }
0x136a   :  { %1864 = vpow2.f32 %v1600_v63 }
0x1377   :  { %v1865_v1 = vpop.eup %1864 }
0x1378   :  { %v942_v3 = vadd.f32 1.0, %v1865_v1 }
0x137a   :  { %1866 = vrcp.f32 %v942_v3 }
0x1387   :  { %v1867_v5 = vpop.eup %1866 }
0x1388   :  { %v955_v8 = vsub.f32 1.0, %v1867_v5  ;;  %v963_v26 = vmul.f32 %v1867_v5, %v961_v20 }
0x13d8   :  { %v946_v7 = vpop.permute.xlu0 %945 }
0x13d9   :  { %v948_v9 = vmul.f32 %v1867_v5, %v946_v7 }
0x13db   :  { %950 = vrot.lane.b32.xlu1 %v948_v9, %s1912_s21 }
0x144d   :  { %v951_v11 = vpop.permute.xlu1 %950 }
0x144e   :  { %v953_v12 = vadd.f32 %v951_v11, %v2034_v21  ;;  %v2192_v21 = vld [vmem:[%s2402_s3 + $0x8] sm:$0xff] }
0x144f   :  { %1778 = vmatpush3.msra.mxu1 %v2192_v21 }
0x1450   :  { %1868 = vtanh.f32 %v953_v12  ;;  %1779 = vmatprep.subr.mxu1 %v1910_v0 }
0x1451   :  { %1780 = vmatpush3.msra.mxu1 %v2199_v14 }
0x1452   :  { %1795 = vmatprep.subr.mxu1 %v1910_v0 }
0x145d   :  { %v1869_v16 = vpop.eup %1868 }
0x145e   :  { %957 = vrot.lane.b32.xlu0 %v1869_v16, %s1913_s2 }
0x14d0   :  { %v958_v23 = vpop.permute.xlu0 %957 }
0x14d1   :  { %v960_v28 = vmul.f32 %v958_v23, %v955_v8 }
0x14d3   :  { %v964_v31 = vadd.f32 %v963_v26, %v960_v28 }
0x14d5   :  { %v2219_v35 = vrot.slane %v964_v31, 6 }
0x14d7   :  { %v991_v37 = vsel %vm977_vm2, %v2219_v35, 0.0 }
0x14d8   :  { %v992_v38 = vadd.f32 %v991_v37, %v990_v36 }
0x14da   :  { %v993_v40 = vmul.f32 0.125, %v992_v38 }
0x14dc   :  { %1001 = vrot.lane.b32.xlu1 %v993_v40, %s1913_s2 }
0x154e   :  { %v1002_v41 = vpop.permute.xlu1 %1001 }
0x154f   :  { %1782 = vmatmul.mubr.msk.f32.vlgmr.msra.gmra.mxu1 %vm47_vm1, %v1002_v41 }
0x1550   :  { %1803 = vmatprep.mubr.msk.f32.mxu1 %vm1911_vm0, %v1910_v0 }
0x160f   :  { %v1071_v43 = vpop.f32.mrf.mxu1 }
0x1610   :  { %v1072_v44 = vadd.f32 %v2230_v42, %v1071_v43 }
0x1611   :  { %v1783_v45 = vpop.f32.mrf.mxu1 }
0x1612   :  { %1076 = vrot.lane.b32.xlu0 %v1072_v44, %s1914_s8 }
0x1684   :  { %v1077_v46 = vpop.permute.xlu0 %1076 }
0x1685   :  { %v1080_v47 = vmul.f32 %v1077_v46, %v2065_v61  ;;  %v1079_v48 = vmul.f32 %v1077_v46, %v2043_v39  ;;  %v1082_v49 = vmul.f32 %v1077_v46, %v2107_v50  ;;  %v1081_v51 = vmul.f32 %v1077_v46, %v2086_v27 }
0x1686   :  { %v1084_v24 = vmul.f32 %v1077_v46, %v2151_v32  ;;  %v1083_v52 = vmul.f32 %v1077_v46, %v2129_v10  ;;  %v1086_v53 = vmul.f32 %v1077_v46, %v2219_v35  ;;  %v1085_v54 = vmul.f32 %v1077_v46, %v2164_v55 }
0x1687   :  { %1097 = vrot.lane.b32.xlu0 %v1080_v47, %s1913_s2  ;;  %1095 = vrot.lane.b32.xlu1 %v1079_v48, %s1913_s2 }
0x168b   :  { %1101 = vrot.lane.b32.xlu0 %v1082_v49, %s1913_s2  ;;  %1099 = vrot.lane.b32.xlu1 %v1081_v51, %s1913_s2 }
0x168f   :  { %1105 = vrot.lane.b32.xlu0 %v1084_v24, %s1913_s2  ;;  %1103 = vrot.lane.b32.xlu1 %v1083_v52, %s1913_s2 }
0x1693   :  { %1109 = vrot.lane.b32.xlu0 %v1086_v53, %s1913_s2  ;;  %1107 = vrot.lane.b32.xlu1 %v1085_v54, %s1913_s2 }
0x16f9   :  { %v1098_v56 = vpop.permute.xlu0 %1097  ;;  %v1096_v57 = vpop.permute.xlu1 %1095 }
0x16fa   :  { %v1123_v58 = vsel %vm1119_vm3, %v1098_v56, 0.0  ;;  %v1120_v59 = vsel %vm1119_vm3, %v1096_v57, 0.0 }
0x16fb   :  { %1124 = vadd.xlane.f32.xlu0 %v1123_v58  ;;  %1121 = vadd.xlane.f32.xlu1 %v1120_v59 }
0x16fd   :  { %v1102_v60 = vpop.permute.xlu0 %1101  ;;  %v1100_v62 = vpop.permute.xlu1 %1099 }
0x16fe   :  { %v1129_v63 = vsel %vm1119_vm3, %v1102_v60, 0.0  ;;  %v1126_v1 = vsel %vm1119_vm3, %v1100_v62, 0.0 }
0x16ff   :  { %1130 = vadd.xlane.f32.xlu1 %v1129_v63  ;;  %1127 = vadd.xlane.f32.xlu0 %v1126_v1 }
0x1701   :  { %v1106_v3 = vpop.permute.xlu0 %1105  ;;  %v1104_v5 = vpop.permute.xlu1 %1103 }
0x1702   :  { %v1135_v7 = vsel %vm1119_vm3, %v1106_v3, 0.0  ;;  %v1132_v9 = vsel %vm1119_vm3, %v1104_v5, 0.0 }
0x1703   :  { %1136 = vadd.xlane.f32.xlu1 %v1135_v7  ;;  %1133 = vadd.xlane.f32.xlu0 %v1132_v9 }
0x1705   :  { %v1110_v11 = vpop.permute.xlu0 %1109  ;;  %v1108_v12 = vpop.permute.xlu1 %1107 }
0x1706   :  { %v1141_v16 = vsel %vm1119_vm3, %v1110_v11, 0.0  ;;  %v1138_v15 = vsel %vm1119_vm3, %v1108_v12, 0.0 }
0x1707   :  { %1142 = vadd.xlane.f32.xlu1 %v1141_v16  ;;  %1139 = vadd.xlane.f32.xlu0 %v1138_v15 }
0x1718   :  { %1315 = vrot.lane.b32.xlu1 %v2184_v13, %s1913_s2 }
0x171c   :  { %1313 = vrot.lane.b32.xlu1 %v2192_v21, %s1913_s2 }
0x171d   :  { %1317 = vrot.lane.b32.xlu0 %v2179_v2, %s1913_s2 }
0x1721   :  { %1311 = vrot.lane.b32.xlu0 %v2199_v14, %s1913_s2 }
0x1725   :  { %1405 = vrot.lane.b32.xlu0 %v2179_v2, %s1912_s21 }
0x1729   :  { %1401 = vrot.lane.b32.xlu0 %v2192_v21, %s1912_s21 }
0x172d   :  { %1399 = vrot.lane.b32.xlu0 %v2199_v14, %s1912_s21 }
0x1784   :  { %v1125_v4 = vpop.xlane.xlu0 %1124  ;;  %v1122_v17 = vpop.xlane.xlu1 %1121 }
0x1785   :  { %v1146_v23 = vsel %vm1144_vm4, %v1125_v4, -inf  ;;  %v1145_v2 = vsel %vm1144_vm4, %v1122_v17, -inf }
0x1788   :  { %v1128_v18 = vpop.xlane.xlu0 %1127  ;;  %v1131_v6 = vpop.xlane.xlu1 %1130 }
0x1789   :  { %v1147_v14 = vsel %vm1144_vm4, %v1128_v18, -inf  ;;  %v1148_v29 = vsel %vm1144_vm4, %v1131_v6, -inf }
0x178c   :  { %v1134_v19 = vpop.xlane.xlu0 %1133  ;;  %v1137_v20 = vpop.xlane.xlu1 %1136 }
0x178d   :  { %v1149_v8 = vsel %vm1144_vm4, %v1134_v19, -inf  ;;  %v1151_v22 = vsel %vm1144_vm4, %v1137_v20, -inf }
0x178e   :  { %v1150_v25 = vmax.f32 %v1145_v2, %v1149_v8  ;;  %v1152_v21 = vmax.f32 %v1146_v23, %v1151_v22 }
0x1790   :  { %v1140_v26 = vpop.xlane.xlu0 %1139  ;;  %v1143_v28 = vpop.xlane.xlu1 %1142  ;;  %v1157_v36 = vmax.f32 %v1150_v25, %v1152_v21 }
0x1791   :  { %v1153_v30 = vsel %vm1144_vm4, %v1140_v26, -inf  ;;  %v1155_v31 = vsel %vm1144_vm4, %v1143_v28, -inf }
0x1792   :  { %v1154_v33 = vmax.f32 %v1147_v14, %v1153_v30  ;;  %v1156_v34 = vmax.f32 %v1148_v29, %v1155_v31 }
0x1794   :  { %v1158_v37 = vmax.f32 %v1154_v33, %v1156_v34  ;;  %v1318_v46 = vpop.permute.xlu0 %1317  ;;  %v1316_v47 = vpop.permute.xlu1 %1315 }
0x1795   :  { %1785 = vmatpush3.msra.mxu0 %v1318_v46 }
0x1796   :  { %v1159_v38 = vmax.f32 %v1157_v36, %v1158_v37  ;;  %1786 = vmatprep.subr.mxu0 %v1910_v0 }
0x1797   :  { %1787 = vmatpush3.msra.mxu0 %v1316_v47 }
0x1798   :  { %v1160_v40 = vsub.f32 %v1122_v17, %v1159_v38  ;;  %v1161_v41 = vsub.f32 %v1125_v4, %v1159_v38  ;;  %v1162_v43 = vsub.f32 %v1128_v18, %v1159_v38  ;;  %v1163_v44 = vsub.f32 %v1131_v6, %v1159_v38  ;;  %1788 = vmatprep.subr.mxu0 %v1910_v0  ;;  %v1314_v56 = vpop.permute.xlu1 %1313  ;;  %v1312_v57 = vpop.permute.xlu0 %1311 }
0x1799   :  { %v1164_v45 = vsub.f32 %v1134_v19, %v1159_v38  ;;  %v1165_v24 = vsub.f32 %v1137_v20, %v1159_v38  ;;  %v1166_v53 = vsub.f32 %v1140_v26, %v1159_v38  ;;  %1789 = vmatpush3.msra.mxu0 %v1314_v56  ;;  %v1167_v58 = vsub.f32 %v1143_v28, %v1159_v38 }
0x179a   :  { %v1168_v48 = vmul.f32 1.442695, %v1160_v40  ;;  %v1170_v49 = vmul.f32 1.442695, %v1161_v41  ;;  %v1172_v51 = vmul.f32 1.442695, %v1162_v43  ;;  %1790 = vmatprep.subr.mxu0 %v1910_v0 }
0x179b   :  { %v1174_v52 = vmul.f32 1.442695, %v1163_v44  ;;  %v1176_v54 = vmul.f32 1.442695, %v1164_v45  ;;  %v1178_v59 = vmul.f32 1.442695, %v1165_v24  ;;  %1791 = vmatpush3.msra.mxu0 %v1312_v57 }
0x179c   :  { %1870 = vpow2.f32 %v1168_v48  ;;  %v1180_v60 = vmul.f32 1.442695, %v1166_v53  ;;  %1806 = vmatprep.subr.mxu0 %v1910_v0  ;;  %v1182_v62 = vmul.f32 1.442695, %v1167_v58 }
0x179d   :  { %1872 = vpow2.f32 %v1170_v49 }
0x179e   :  { %1874 = vpow2.f32 %v1172_v51 }
0x179f   :  { %1876 = vpow2.f32 %v1174_v52 }
0x17a0   :  { %1878 = vpow2.f32 %v1176_v54 }
0x17a1   :  { %1880 = vpow2.f32 %v1178_v59 }
0x17a2   :  { %1882 = vpow2.f32 %v1180_v60 }
0x17a3   :  { %1884 = vpow2.f32 %v1182_v62 }
0x17a9   :  { %v1871_v63 = vpop.eup %1870 }
0x17aa   :  { %v1873_v1 = vpop.eup %1872  ;;  %v1184_v3 = vsel %vm1144_vm4, %v1871_v63, 0.0 }
0x17ab   :  { %v1875_v5 = vpop.eup %1874  ;;  %v1185_v7 = vsel %vm1144_vm4, %v1873_v1, 0.0 }
0x17ac   :  { %v1877_v9 = vpop.eup %1876  ;;  %v1186_v11 = vadd.f32 %v1185_v7, %v1184_v3  ;;  %v1187_v12 = vsel %vm1144_vm4, %v1875_v5, 0.0 }
0x17ad   :  { %v1879_v16 = vpop.eup %1878  ;;  %v1189_v4 = vsel %vm1144_vm4, %v1877_v9, 0.0 }
0x17ae   :  { %v1188_v15 = vadd.f32 %v1187_v12, %v1186_v11  ;;  %v1881_v17 = vpop.eup %1880  ;;  %v1191_v6 = vsel %vm1144_vm4, %v1879_v16, 0.0 }
0x17af   :  { %v1883_v19 = vpop.eup %1882  ;;  %v1193_v8 = vsel %vm1144_vm4, %v1881_v17, 0.0 }
0x17b0   :  { %v1190_v18 = vadd.f32 %v1189_v4, %v1188_v15  ;;  %v1885_v22 = vpop.eup %1884  ;;  %v1195_v2 = vsel %vm1144_vm4, %v1883_v19, 0.0 }
0x17b1   :  { %v1197_v21 = vsel %vm1144_vm4, %v1885_v22, 0.0 }
0x17b2   :  { %v1192_v20 = vadd.f32 %v1191_v6, %v1190_v18 }
0x17b4   :  { %v1194_v23 = vadd.f32 %v1193_v8, %v1192_v20 }
0x17b6   :  { %v1196_v25 = vadd.f32 %v1195_v2, %v1194_v23 }
0x17b8   :  { %v1198_v26 = vadd.f32 %v1197_v21, %v1196_v25 }
0x17ba   :  { %1886 = vrcp.f32 %v1198_v26 }
0x17c7   :  { %v1887_v28 = vpop.eup %1886 }
0x17c8   :  { %v2291_v14 = vmul.f32 %v1887_v28, %v1871_v63  ;;  %v2293_v29 = vmul.f32 %v1887_v28, %v1873_v1  ;;  %v2295_v30 = vmul.f32 %v1887_v28, %v1875_v5  ;;  %v2297_v31 = vmul.f32 %v1887_v28, %v1877_v9 }
0x17c9   :  { %v2299_v33 = vmul.f32 %v1887_v28, %v1879_v16  ;;  %v2301_v34 = vmul.f32 %v1887_v28, %v1881_v17  ;;  %v2303_v36 = vmul.f32 %v1887_v28, %v1883_v19  ;;  %v2308_v41 = vmul.f32 %v1887_v28, %v1885_v22 }
0x17ca   :  { %v1208_v37 = vadd.f32 1e-09, %v2291_v14  ;;  %v1209_v38 = vadd.f32 1e-09, %v2293_v29  ;;  %v1210_v40 = vadd.f32 1e-09, %v2295_v30 }
0x17cb   :  { %v1211_v43 = vadd.f32 1e-09, %v2297_v31  ;;  %v1212_v44 = vadd.f32 1e-09, %v2299_v33  ;;  %v1213_v45 = vadd.f32 1e-09, %v2301_v34 }
0x17cc   :  { %1888 = vlog2.f32 %v1208_v37  ;;  %v1214_v46 = vadd.f32 1e-09, %v2303_v36  ;;  %v1215_v47 = vadd.f32 1e-09, %v2308_v41 }
0x17cd   :  { %1890 = vlog2.f32 %v1209_v38 }
0x17ce   :  { %1892 = vlog2.f32 %v1210_v40 }
0x17cf   :  { %1894 = vlog2.f32 %v1211_v43 }
0x17d0   :  { %1896 = vlog2.f32 %v1212_v44 }
0x17d1   :  { %1898 = vlog2.f32 %v1213_v45 }
0x17d2   :  { %1900 = vlog2.f32 %v1214_v46 }
0x17d3   :  { %1902 = vlog2.f32 %v1215_v47 }
0x17d9   :  { %v1889_v48 = vpop.eup %1888 }
0x17da   :  { %v1891_v49 = vpop.eup %1890  ;;  %v1217_v51 = vmul.f32 0.6931472, %v1889_v48 }
0x17db   :  { %v1893_v24 = vpop.eup %1892  ;;  %v1219_v52 = vmul.f32 0.6931472, %v1891_v49 }
0x17dc   :  { %v1895_v53 = vpop.eup %1894  ;;  %v1221_v54 = vmul.f32 0.6931472, %v1893_v24  ;;  %v1232_v56 = vmul.f32 %v1217_v51, %v2291_v14 }
0x17dd   :  { %v1897_v57 = vpop.eup %1896  ;;  %v1223_v58 = vmul.f32 0.6931472, %v1895_v53  ;;  %v1233_v59 = vmul.f32 %v1219_v52, %v2293_v29 }
0x17de   :  { %v1899_v60 = vpop.eup %1898  ;;  %v1225_v62 = vmul.f32 0.6931472, %v1897_v57  ;;  %v1234_v63 = vmul.f32 %v1221_v54, %v2295_v30  ;;  %v1240_v1 = vsel %vm1144_vm4, %v1232_v56, 0.0 }
0x17df   :  { %v1901_v3 = vpop.eup %1900  ;;  %v1227_v5 = vmul.f32 0.6931472, %v1899_v60  ;;  %v1235_v7 = vmul.f32 %v1223_v58, %v2297_v31  ;;  %v1241_v9 = vsel %vm1144_vm4, %v1233_v59, 0.0 }
0x17e0   :  { %v1903_v11 = vpop.eup %1902  ;;  %v1242_v12 = vadd.f32 %v1241_v9, %v1240_v1  ;;  %v1229_v16 = vmul.f32 0.6931472, %v1901_v3  ;;  %v1236_v15 = vmul.f32 %v1225_v62, %v2299_v33  ;;  %v1243_v4 = vsel %vm1144_vm4, %v1234_v63, 0.0  ;;  %v1406_v9 = vpop.permute.xlu0 %1405 }
0x17e1   :  { %v1231_v18 = vmul.f32 0.6931472, %v1903_v11  ;;  %v1237_v6 = vmul.f32 %v1227_v5, %v2301_v34  ;;  %v1245_v19 = vsel %vm1144_vm4, %v1235_v7, 0.0  ;;  %1796 = vmatpush3.msra.mxu1 %v1406_v9 }
0x17e2   :  { %v1244_v17 = vadd.f32 %v1243_v4, %v1242_v12  ;;  %v1238_v8 = vmul.f32 %v1229_v16, %v2303_v36  ;;  %v1247_v22 = vsel %vm1144_vm4, %v1236_v15, 0.0  ;;  %1797 = vmatprep.subr.mxu1 %v1910_v0 }
0x17e3   :  { %v1239_v2 = vmul.f32 %v1231_v18, %v2308_v41  ;;  %v1249_v25 = vsel %vm1144_vm4, %v1237_v6, 0.0 }
0x17e4   :  { %v1246_v20 = vadd.f32 %v1245_v19, %v1244_v17  ;;  %v1251_v26 = vsel %vm1144_vm4, %v1238_v8, 0.0 }
0x17e5   :  { %v1253_v37 = vsel %vm1144_vm4, %v1239_v2, 0.0 }
0x17e6   :  { %v1248_v23 = vadd.f32 %v1247_v22, %v1246_v20  ;;  %v1402_v22 = vpop.permute.xlu0 %1401 }
0x17e8   :  { %v1250_v21 = vadd.f32 %v1249_v25, %v1248_v23  ;;  %v1490_v23 = vld [vmem:[%s2404_s5 + $0x10] sm:$0xff] }
0x17ea   :  { %v1252_v28 = vadd.f32 %v1251_v26, %v1250_v21 }
0x17ec   :  { %v1254_v38 = vadd.f32 %v1253_v37, %v1252_v28  ;;  %v1489_v28 = vld [vmem:[%s2404_s5 + $0x8] sm:$0xff]  ;;  %v1488_v37 = vld [vmem:[%s2404_s5] sm:$0xff] }
0x17ee   :  { %v1255_v40 = vsub.f32 0.0, %v1254_v38  ;;  %v12_v38 = vstv %s2405_s6 }
0x17ef   :  { %13 = vst [vmem:[#allocation2] sm:$0x1] %v12_v38 }
0x17f0   :  { %1904 = vrcp.f32 %v1255_v40 }
0x17fd   :  { %v1905_v43 = vpop.eup %1904 }
0x17fe   :  { %v1257_v44 = vmul.f32 %v1905_v43, %v2291_v14  ;;  %v1258_v45 = vmul.f32 %v1905_v43, %v2293_v29  ;;  %v1259_v46 = vmul.f32 %v1905_v43, %v2295_v30  ;;  %v1260_v47 = vmul.f32 %v1905_v43, %v2297_v31 }
0x17ff   :  { %v1261_v48 = vmul.f32 %v1905_v43, %v2299_v33  ;;  %v1262_v52 = vmul.f32 %v1905_v43, %v2301_v34  ;;  %v1263_v30 = vmul.f32 %v1905_v43, %v2303_v36  ;;  %v1264_v34 = vmul.f32 %v1905_v43, %v2308_v41 }
0x1800   :  { %v1265_v49 = vmul.f32 %v1257_v44, %v2043_v39  ;;  %v1266_v51 = vmul.f32 %v1258_v45, %v2065_v61  ;;  %v1267_v24 = vmul.f32 %v1259_v46, %v2086_v27  ;;  %v1268_v53 = vmul.f32 %v1260_v47, %v2107_v50 }
0x1801   :  { %v1269_v31 = vmul.f32 %v1261_v48, %v2129_v10  ;;  %v1288_v39 = vsel %vm1144_vm4, %v1257_v44, 0.0  ;;  %v1289_v61 = vsel %vm1144_vm4, %v1258_v45, 0.0  ;;  %v1270_v50 = vmul.f32 %v1262_v52, %v2151_v32 }
0x1802   :  { %v1273_v14 = vsel %vm977_vm2, %v1265_v49, 0.0  ;;  %v1274_v29 = vsel %vm977_vm2, %v1266_v51, 0.0  ;;  %v1276_v33 = vsel %vm977_vm2, %v1267_v24, 0.0  ;;  %v1290_v56 = vadd.f32 %v1289_v61, %v1288_v39 }
0x1803   :  { %v1275_v54 = vadd.f32 %v1274_v29, %v1273_v14  ;;  %v1278_v57 = vsel %vm977_vm2, %v1268_v53, 0.0  ;;  %v1291_v58 = vsel %vm1144_vm4, %v1259_v46, 0.0  ;;  %v1271_v10 = vmul.f32 %v1263_v30, %v2164_v55 }
0x1804   :  { %v1292_v59 = vadd.f32 %v1291_v58, %v1290_v56  ;;  %v1280_v60 = vsel %vm977_vm2, %v1269_v31, 0.0  ;;  %v1293_v62 = vsel %vm1144_vm4, %v1260_v47, 0.0  ;;  %v1272_v3 = vmul.f32 %v1264_v34, %v2219_v35  ;;  %v1605_v47 = vld [vmem:[#allocation2] ss:$0 sm:$0xff] }
0x1805   :  { %v1277_v27 = vadd.f32 %v1276_v33, %v1275_v54  ;;  %v1282_v41 = vsel %vm977_vm2, %v1270_v50, 0.0  ;;  %v1295_v32 = vsel %vm1144_vm4, %v1261_v48, 0.0  ;;  %v1284_v11 = vsel %vm977_vm2, %v1271_v10, 0.0 }
0x1806   :  { %v1294_v1 = vadd.f32 %v1293_v62, %v1292_v59  ;;  %v1297_v12 = vsel %vm1144_vm4, %v1262_v52, 0.0  ;;  %v1286_v15 = vsel %vm977_vm2, %v1272_v3, 0.0  ;;  %v1299_v35 = vsel %vm1144_vm4, %v1263_v30, 0.0 }
0x1807   :  { %v1279_v36 = vadd.f32 %v1278_v57, %v1277_v27  ;;  %v1301_v18 = vsel %vm1144_vm4, %v1264_v34, 0.0 }
0x1808   :  { %v1296_v7 = vadd.f32 %v1295_v32, %v1294_v1 }
0x1809   :  { %v1281_v63 = vadd.f32 %v1280_v60, %v1279_v36 }
0x180a   :  { %v1298_v16 = vadd.f32 %v1297_v12, %v1296_v7 }
0x180b   :  { %v1283_v5 = vadd.f32 %v1282_v41, %v1281_v63 }
0x180c   :  { %v1300_v17 = vadd.f32 %v1299_v35, %v1298_v16 }
0x180d   :  { %v1285_v55 = vadd.f32 %v1284_v11, %v1283_v5 }
0x180e   :  { %v1302_v6 = vadd.f32 %v1301_v18, %v1300_v17 }
0x180f   :  { %v1287_v4 = vadd.f32 %v1286_v15, %v1285_v55 }
0x1810   :  { %v1303_v19 = vmul.f32 %v2230_v42, %v1302_v6 }
0x1811   :  { %1305 = vrot.lane.b32.xlu1 %v1287_v4, %s1913_s2 }
0x1815   :  { %1403 = vrot.lane.b32.xlu1 %v2184_v13, %s1912_s21  ;;  %v1400_v13 = vpop.permute.xlu0 %1399 }
0x1819   :  { %1324 = vrot.lane.b32.xlu1 %v1303_v19, %s1913_s2 }
0x181d   :  { %1411 = vrot.lane.b32.xlu1 %v2230_v42, %s1912_s21  ;;  %v1491_v42 = vld [vmem:[%s2404_s5 + $0x18] sm:$0xff] }
0x1883   :  { %v1306_v20 = vpop.permute.xlu1 %1305 }
0x1884   :  { %1793 = vmatmul.mubr.msk.f32.vlgmr.msra.gmra.mxu0 %vm47_vm1, %v1306_v20 }
0x1885   :  { %1814 = vmatprep.mubr.msk.f32.mxu0 %vm1911_vm0, %v1910_v0  ;;  %1807 = vmatpush3.msra.mxu0 %v1491_v42 }
0x1886   :  { %1808 = vmatprep.subr.mxu0 %v1910_v0 }
0x1887   :  { %v1404_v8 = vpop.permute.xlu1 %1403  ;;  %1809 = vmatpush3.msra.mxu0 %v1490_v23 }
0x1888   :  { %1798 = vmatpush3.msra.mxu1 %v1404_v8  ;;  %1810 = vmatprep.subr.mxu0 %v1910_v0 }
0x1889   :  { %1799 = vmatprep.subr.mxu1 %v1910_v0  ;;  %1811 = vmatpush3.msra.mxu0 %v1489_v28 }
0x188a   :  { %1800 = vmatpush3.msra.mxu1 %v1402_v22  ;;  %1812 = vmatprep.subr.mxu0 %v1910_v0 }
0x188b   :  { %1801 = vmatprep.subr.mxu1 %v1910_v0  ;;  %v1325_v2 = vpop.permute.xlu1 %1324  ;;  %1813 = vmatpush3.msra.mxu0 %v1488_v37 }
0x188c   :  { %1802 = vmatpush3.msra.mxu1 %v1400_v13 }
0x188f   :  { %v1412_v40 = vpop.permute.xlu1 %1411 }
0x1944   :  { %v1395_v25 = vpop.f32.mrf.mxu0 }
0x1945   :  { %v1396_v21 = vadd.f32 %v1395_v25, %v1325_v2 }
0x1946   :  { %v1794_v26 = vpop.f32.mrf.mxu0 }
0x1947   :  { %1804 = vmatmul.mubr.msk.f32.vlgmr.msra.gmra.mxu1 %vm47_vm1, %v1396_v21 }
0x1a07   :  { %v1483_v43 = vpop.f32.mrf.mxu1 }
0x1a08   :  { %v1484_v44 = vadd.f32 %v1483_v43, %v1412_v40 }
0x1a09   :  { %v1805_v45 = vpop.f32.mrf.mxu1 }
0x1a0a   :  { %v1487_v46 = vmax.f32 %v1484_v44, 0.0 }
0x1a0c   :  { %1815 = vmatmul.mubr.msk.f32.vlgmr.msra.gmra.mxu0 %vm47_vm1, %v1487_v46 }
0x1acc   :  { %v1568_v48 = vpop.f32.mrf.mxu0 }
0x1acd   :  { %v1569_v49 = vadd.f32 %v1605_v47, %v1568_v48 }
0x1ace   :  { %v1816_v51 = vpop.f32.mrf.mxu0 }
0x1acf   :  { %v1607_v24 = vmul.f32 -1.442695, %v1569_v49 }
0x1ad1   :  { %1906 = vpow2.f32 %v1607_v24 }
0x1ade   :  { %v1907_v0 = vpop.eup %1906 }
0x1adf   :  { %v1575_v52 = vadd.f32 1.0, %v1907_v0 }
0x1ae1   :  { %1908 = vrcp.f32 %v1575_v52 }
0x1aee   :  { %v1909_v53 = vpop.eup %1908 }
0x1aef   :  { %1579 = vst.msk [vmem:[%s2406_s7] sm:$0x3] %vm1578_vm5, %v1909_v53 }

</bundles_post_ra>
